<compile_context>
chip_gen: v7x
topology: tpu7x:2x2x1
jax: 0.10.0
libtpu: 0.0.40
codegen_flags: <defaults>
</compile_context>

<pallas_src>
import functools

import jax
import jax.numpy as jnp
from jax import lax
from jax.experimental import pallas as pl
from jax.experimental.pallas import tpu as pltpu

BN_EPS = 1e-5


def _conv_stats_kernel(x_ref, w_ref, y_ref, stats_ref, *, tile_h, out_w):
    """Pass 1: 3x3 conv for one (batch, row-tile) block + per-channel sum / sumsq.

    x_ref:     (1, H+2, W+2, Cin)   whole zero-padded image of this batch element
    w_ref:     (9*Cin, Cout)        weight, (di, dj, ci)-major rows
    y_ref:     (tile_h*W, Cout)     raw conv output rows of this tile
    stats_ref: (2, Cout)            [sum; sum of squares], resident accumulator
    """
    n_i = pl.program_id(0)
    h_i = pl.program_id(1)

    @pl.when((n_i == 0) & (h_i == 0))
    def _init():
        stats_ref[...] = jnp.zeros_like(stats_ref)

    base = h_i * tile_h  # first output row of this tile == padded-input row of tap di=0

    # Load the tile_h + 2 padded input rows this tile touches (once each).
    rows = [x_ref[0, base + r, :, :] for r in range(tile_h + 2)]  # each (W+2, Cin)

    # Build the im2col patch for this tile entirely in VMEM (no HBM expansion):
    # row (h*W + w) holds x_pad[base+h+di, w+dj, ci] with columns ordered (di, dj, ci).
    row_patches = []
    for h in range(tile_h):                       # static unroll (tile_h <= 8 typically)
        taps = []
        for di in range(3):
            r = rows[h + di]
            for dj in range(3):
                taps.append(r[dj:dj + out_w, :])  # (W, Cin)
        row_patches.append(jnp.concatenate(taps, axis=1))       # (W, 9*Cin)
    patches = jnp.concatenate(row_patches, axis=0)               # (tile_h*W, 9*Cin)

    # One MXU matmul per tile; f32 accumulation.  (Conv bias omitted: BN cancels it.)
    y = jnp.dot(patches, w_ref[...], preferred_element_type=jnp.float32)
    y_ref[...] = y

    # Single-pass statistics: per-channel sum and sum-of-squares for this tile.
    tile_sum = jnp.sum(y, axis=0, keepdims=True)
    tile_sq = jnp.sum(y * y, axis=0, keepdims=True)
    stats_ref[...] = stats_ref[...] + jnp.concatenate([tile_sum, tile_sq], axis=0)


def _bn_affine_relu_kernel(y_ref, stats_ref, gamma_ref, beta_ref, o_ref, *,
                           inv_count, with_nonlinearity):
    """Pass 2: y * scale + shift (+ ReLU), scale/shift folded from batch stats."""
    s = stats_ref[0:1, :]                       # (1, Cout) sum
    ss = stats_ref[1:2, :]                      # (1, Cout) sum of squares
    mean = s * inv_count
    var = jnp.maximum(ss * inv_count - mean * mean, 0.0)
    inv = lax.rsqrt(var + BN_EPS)
    scale = gamma_ref[...] * inv                # (1, Cout)
    shift = beta_ref[...] - mean * scale        # (1, Cout)

    y = y_ref[...] * scale + shift              # single FMA epilogue
    if with_nonlinearity:
        y = jnp.maximum(y, 0.0)
    o_ref[...] = y


def conv_block(x_nchw, weight, bias, gamma, beta, *, with_nonlinearity=True):
    """ConvBlock forward.  x_nchw: (N, Cin, H, W).  Returns (N, Cout, H, W)."""
    del bias  # BatchNorm over batch statistics cancels a per-channel conv bias exactly.

    N, Cin, H, W = x_nchw.shape
    Cout, Cin2, KH, KW = weight.shape
    assert (KH, KW) == (3, 3) and Cin2 == Cin

    # ---- layout glue: NCHW -> NHWC, zero-pad spatial dims by 1 -------------
    x = jnp.transpose(x_nchw, (0, 2, 3, 1)).astype(jnp.float32)
    xp = jnp.pad(x, ((0, 0), (1, 1), (1, 1), (0, 0)))            # (N, H+2, W+2, Cin)

    # weight (O, I, kh, kw) -> (kh, kw, I, O) -> (9*Cin, Cout): rows ordered
    # (di, dj, ci) to match the in-kernel patch column order.  No channel padding.
    w_mat = jnp.transpose(weight, (2, 3, 1, 0)).reshape(KH * KW * Cin, Cout)
    w_mat = w_mat.astype(jnp.float32)

    # ---- tiling ------------------------------------------------------------
    tile_h = 8 if H % 8 == 0 else H       # output rows per grid step (sublane-aligned)
    n_h = H // tile_h
    tile_m = tile_h * W                   # rows of the flattened output per tile
    M = N * H * W                         # true BN element count per channel

    # ---- pass 1: conv + per-channel sum / sumsq ----------------------------
    kernel1 = functools.partial(_conv_stats_kernel, tile_h=tile_h, out_w=W)
    y_flat, stats = pl.pallas_call(
        kernel1,
        out_shape=(jax.ShapeDtypeStruct((M, Cout), jnp.float32),
                   jax.ShapeDtypeStruct((2, Cout), jnp.float32)),
        grid=(N, n_h),
        in_specs=[
            # whole padded image of batch n, re-used across all of its row tiles
            pl.BlockSpec((1, H + 2, W + 2, Cin), lambda n, hi: (n, 0, 0, 0)),
            pl.BlockSpec((KH * KW * Cin, Cout), lambda n, hi: (0, 0)),
        ],
        out_specs=(
            pl.BlockSpec((tile_m, Cout), lambda n, hi: (n * n_h + hi, 0)),
            pl.BlockSpec((2, Cout), lambda n, hi: (0, 0)),     # resident accumulator
        ),
        compiler_params=pltpu.CompilerParams(
            # stats accumulation couples every grid step -> keep sequential
            dimension_semantics=("arbitrary", "arbitrary")),
    )(xp, w_mat)

    # ---- pass 2: fused normalize + affine + ReLU ----------------------------
    gamma2 = gamma.reshape(1, Cout).astype(jnp.float32)
    beta2 = beta.reshape(1, Cout).astype(jnp.float32)

    kernel2 = functools.partial(_bn_affine_relu_kernel, inv_count=1.0 / M,
                                with_nonlinearity=with_nonlinearity)
    out_flat = pl.pallas_call(
        kernel2,
        out_shape=jax.ShapeDtypeStruct((M, Cout), jnp.float32),
        grid=(M // tile_m,),
        in_specs=[
            pl.BlockSpec((tile_m, Cout), lambda i: (i, 0)),
            pl.BlockSpec((2, Cout), lambda i: (0, 0)),
            pl.BlockSpec((1, Cout), lambda i: (0, 0)),
            pl.BlockSpec((1, Cout), lambda i: (0, 0)),
        ],
        out_specs=pl.BlockSpec((tile_m, Cout), lambda i: (i, 0)),
        compiler_params=pltpu.CompilerParams(
            # elementwise pass: let both TensorCores split the row tiles (v7x)
            dimension_semantics=("parallel",)),
    )(y_flat, stats, gamma2, beta2)

    # ---- layout glue: back to NCHW ------------------------------------------
    out = out_flat.reshape(N, H, W, Cout)
    return jnp.transpose(out, (0, 3, 1, 2))


def _reference(x_nchw, weight, bias, gamma, beta, with_nonlinearity=True):
    y = lax.conv_general_dilated(
        x_nchw.astype(jnp.float32), weight.astype(jnp.float32),
        window_strides=(1, 1), padding=((1, 1), (1, 1)),
        dimension_numbers=("NCHW", "OIHW", "NCHW"))
    y = y + bias[None, :, None, None]
    mean = jnp.mean(y, axis=(0, 2, 3), keepdims=True)
    var = jnp.mean((y - mean) ** 2, axis=(0, 2, 3), keepdims=True)
    y = (y - mean) * lax.rsqrt(var + BN_EPS)
    y = y * gamma[None, :, None, None] + beta[None, :, None, None]
    if with_nonlinearity:
        y = jnp.maximum(y, 0.0)
    return y


if __name__ == "__main__":
    # Small shapes consistent with ConvBlock(in_channels=4, out_channels=8)
    N, Cin, Cout, H, W = 2, 4, 8, 16, 16

    key = jax.random.PRNGKey(0)
    k_x, k_w, k_b = jax.random.split(key, 3)

    x = jax.random.normal(k_x, (N, Cin, H, W), jnp.float32)
    fan_in = Cin * 3 * 3
    weight = jax.random.normal(k_w, (Cout, Cin, 3, 3), jnp.float32) / jnp.sqrt(fan_in)
    bias = jax.random.normal(k_b, (Cout,), jnp.float32) * 0.1
    gamma = jnp.ones((Cout,), jnp.float32)   # BatchNorm2d default affine init
    beta = jnp.zeros((Cout,), jnp.float32)

    fwd = jax.jit(functools.partial(conv_block, with_nonlinearity=True))
    out = fwd(x, weight, bias, gamma, beta)
    out = jax.block_until_ready(out)

    ref = _reference(x, weight, bias, gamma, beta, with_nonlinearity=True)
    assert out.shape == (N, Cout, H, W)
    assert jnp.allclose(out, ref, atol=1e-4, rtol=1e-4), "mismatch vs reference"

    print("KERNEL_OK")
</pallas_src>

<mosaic_0001>
module attributes {stable_mosaic.version = 11 : i64} {
  func.func @_conv_stats_kernel(%arg0: i32, %arg1: i32, %arg2: memref<1x18x18x4xf32, #tpu.memory_space<vmem>>, %arg3: memref<36x8xf32, #tpu.memory_space<vmem>>, %arg4: memref<128x8xf32, #tpu.memory_space<vmem>>, %arg5: memref<2x8xf32, #tpu.memory_space<vmem>>) attributes {dimension_semantics = [#tpu.dimension_semantics<arbitrary>, #tpu.dimension_semantics<arbitrary>], iteration_bounds = array<i64: 2, 2>, scalar_prefetch = 0 : i64, scratch_operands = 0 : i64, tpu.core_type = #tpu.core_type<tc>, window_params = [{transform_indices = @transform_0, window_bounds = array<i64: 1, 18, 18, 4>}, {pipeline_mode = #tpu.pipeline_mode<synchronous>, transform_indices = @transform_1, window_bounds = array<i64: 36, 8>}, {transform_indices = @transform_2, window_bounds = array<i64: 128, 8>}, {pipeline_mode = #tpu.pipeline_mode<synchronous>, transform_indices = @transform_3, window_bounds = array<i64: 2, 8>}]} {
    %c0_i32 = arith.constant 0 : i32
    %0 = arith.cmpi eq, %arg0, %c0_i32 : i32
    %c0_i32_0 = arith.constant 0 : i32
    %1 = arith.cmpi eq, %arg1, %c0_i32_0 : i32
    %2 = arith.andi %0, %1 : i1
    %3 = arith.extui %2 : i1 to i32
    %c0_i32_1 = arith.constant 0 : i32
    %4 = arith.cmpi ne, %3, %c0_i32_1 : i32
    scf.if %4 {
      %cst_43 = arith.constant 0.000000e+00 : f32
      %139 = vector.broadcast %cst_43 : f32 to vector<2x8xf32>
      %c0_44 = arith.constant 0 : index
      %c0_45 = arith.constant 0 : index
      %140 = vector.load %arg5[%c0_44, %c0_45] : memref<2x8xf32, #tpu.memory_space<vmem>>, vector<2x8xf32>
      tpu.vector_store %arg5[%c0_44, %c0_45], %139 {strides = array<i32>} : memref<2x8xf32, #tpu.memory_space<vmem>>, vector<2x8xf32>,
    } else {
    }
    %c8_i32 = arith.constant 8 : i32
    %5 = arith.muli %arg1, %c8_i32 : i32
    %c0_i32_2 = arith.constant 0 : i32
    %6 = arith.addi %5, %c0_i32_2 : i32
    %c0 = arith.constant 0 : index
    %7 = arith.index_cast %6 : i32 to index
    %c0_3 = arith.constant 0 : index
    %c0_4 = arith.constant 0 : index
    %8 = vector.load %arg2[%c0, %7, %c0_3, %c0_4] : memref<1x18x18x4xf32, #tpu.memory_space<vmem>>, vector<1x1x18x4xf32>
    %9 = vector.shape_cast %8 : vector<1x1x18x4xf32> to vector<18x4xf32>
    %c1_i32 = arith.constant 1 : i32
    %10 = arith.addi %5, %c1_i32 : i32
    %c0_5 = arith.constant 0 : index
    %11 = arith.index_cast %10 : i32 to index
    %c0_6 = arith.constant 0 : index
    %c0_7 = arith.constant 0 : index
    %12 = vector.load %arg2[%c0_5, %11, %c0_6, %c0_7] : memref<1x18x18x4xf32, #tpu.memory_space<vmem>>, vector<1x1x18x4xf32>
    %13 = vector.shape_cast %12 : vector<1x1x18x4xf32> to vector<18x4xf32>
    %c2_i32 = arith.constant 2 : i32
    %14 = arith.addi %5, %c2_i32 : i32
    %c0_8 = arith.constant 0 : index
    %15 = arith.index_cast %14 : i32 to index
    %c0_9 = arith.constant 0 : index
    %c0_10 = arith.constant 0 : index
    %16 = vector.load %arg2[%c0_8, %15, %c0_9, %c0_10] : memref<1x18x18x4xf32, #tpu.memory_space<vmem>>, vector<1x1x18x4xf32>
    %17 = vector.shape_cast %16 : vector<1x1x18x4xf32> to vector<18x4xf32>
    %c3_i32 = arith.constant 3 : i32
    %18 = arith.addi %5, %c3_i32 : i32
    %c0_11 = arith.constant 0 : index
    %19 = arith.index_cast %18 : i32 to index
    %c0_12 = arith.constant 0 : index
    %c0_13 = arith.constant 0 : index
    %20 = vector.load %arg2[%c0_11, %19, %c0_12, %c0_13] : memref<1x18x18x4xf32, #tpu.memory_space<vmem>>, vector<1x1x18x4xf32>
    %21 = vector.shape_cast %20 : vector<1x1x18x4xf32> to vector<18x4xf32>
    %c4_i32 = arith.constant 4 : i32
    %22 = arith.addi %5, %c4_i32 : i32
    %c0_14 = arith.constant 0 : index
    %23 = arith.index_cast %22 : i32 to index
    %c0_15 = arith.constant 0 : index
    %c0_16 = arith.constant 0 : index
    %24 = vector.load %arg2[%c0_14, %23, %c0_15, %c0_16] : memref<1x18x18x4xf32, #tpu.memory_space<vmem>>, vector<1x1x18x4xf32>
    %25 = vector.shape_cast %24 : vector<1x1x18x4xf32> to vector<18x4xf32>
    %c5_i32 = arith.constant 5 : i32
    %26 = arith.addi %5, %c5_i32 : i32
    %c0_17 = arith.constant 0 : index
    %27 = arith.index_cast %26 : i32 to index
    %c0_18 = arith.constant 0 : index
    %c0_19 = arith.constant 0 : index
    %28 = vector.load %arg2[%c0_17, %27, %c0_18, %c0_19] : memref<1x18x18x4xf32, #tpu.memory_space<vmem>>, vector<1x1x18x4xf32>
    %29 = vector.shape_cast %28 : vector<1x1x18x4xf32> to vector<18x4xf32>
    %c6_i32 = arith.constant 6 : i32
    %30 = arith.addi %5, %c6_i32 : i32
    %c0_20 = arith.constant 0 : index
    %31 = arith.index_cast %30 : i32 to index
    %c0_21 = arith.constant 0 : index
    %c0_22 = arith.constant 0 : index
    %32 = vector.load %arg2[%c0_20, %31, %c0_21, %c0_22] : memref<1x18x18x4xf32, #tpu.memory_space<vmem>>, vector<1x1x18x4xf32>
    %33 = vector.shape_cast %32 : vector<1x1x18x4xf32> to vector<18x4xf32>
    %c7_i32 = arith.constant 7 : i32
    %34 = arith.addi %5, %c7_i32 : i32
    %c0_23 = arith.constant 0 : index
    %35 = arith.index_cast %34 : i32 to index
    %c0_24 = arith.constant 0 : index
    %c0_25 = arith.constant 0 : index
    %36 = vector.load %arg2[%c0_23, %35, %c0_24, %c0_25] : memref<1x18x18x4xf32, #tpu.memory_space<vmem>>, vector<1x1x18x4xf32>
    %37 = vector.shape_cast %36 : vector<1x1x18x4xf32> to vector<18x4xf32>
    %c8_i32_26 = arith.constant 8 : i32
    %38 = arith.addi %5, %c8_i32_26 : i32
    %c0_27 = arith.constant 0 : index
    %39 = arith.index_cast %38 : i32 to index
    %c0_28 = arith.constant 0 : index
    %c0_29 = arith.constant 0 : index
    %40 = vector.load %arg2[%c0_27, %39, %c0_28, %c0_29] : memref<1x18x18x4xf32, #tpu.memory_space<vmem>>, vector<1x1x18x4xf32>
    %41 = vector.shape_cast %40 : vector<1x1x18x4xf32> to vector<18x4xf32>
    %c9_i32 = arith.constant 9 : i32
    %42 = arith.addi %5, %c9_i32 : i32
    %c0_30 = arith.constant 0 : index
    %43 = arith.index_cast %42 : i32 to index
    %c0_31 = arith.constant 0 : index
    %c0_32 = arith.constant 0 : index
    %44 = vector.load %arg2[%c0_30, %43, %c0_31, %c0_32] : memref<1x18x18x4xf32, #tpu.memory_space<vmem>>, vector<1x1x18x4xf32>
    %45 = vector.shape_cast %44 : vector<1x1x18x4xf32> to vector<18x4xf32>
    %46 = vector.extract_strided_slice %9 {offsets = [0, 0], sizes = [16, 4], strides = [1, 1]} : vector<18x4xf32> to vector<16x4xf32>
    %47 = vector.extract_strided_slice %9 {offsets = [1, 0], sizes = [16, 4], strides = [1, 1]} : vector<18x4xf32> to vector<16x4xf32>
    %48 = vector.extract_strided_slice %9 {offsets = [2, 0], sizes = [16, 4], strides = [1, 1]} : vector<18x4xf32> to vector<16x4xf32>
    %49 = vector.extract_strided_slice %13 {offsets = [0, 0], sizes = [16, 4], strides = [1, 1]} : vector<18x4xf32> to vector<16x4xf32>
    %50 = vector.extract_strided_slice %13 {offsets = [1, 0], sizes = [16, 4], strides = [1, 1]} : vector<18x4xf32> to vector<16x4xf32>
    %51 = vector.extract_strided_slice %13 {offsets = [2, 0], sizes = [16, 4], strides = [1, 1]} : vector<18x4xf32> to vector<16x4xf32>
    %52 = vector.extract_strided_slice %17 {offsets = [0, 0], sizes = [16, 4], strides = [1, 1]} : vector<18x4xf32> to vector<16x4xf32>
    %53 = vector.extract_strided_slice %17 {offsets = [1, 0], sizes = [16, 4], strides = [1, 1]} : vector<18x4xf32> to vector<16x4xf32>
    %54 = vector.extract_strided_slice %17 {offsets = [2, 0], sizes = [16, 4], strides = [1, 1]} : vector<18x4xf32> to vector<16x4xf32>
    %55 = tpu.concatenate %46, %47, %48, %49, %50, %51, %52, %53, %54 in 1 : vector<16x4xf32>, vector<16x4xf32>, vector<16x4xf32>, vector<16x4xf32>, vector<16x4xf32>, vector<16x4xf32>, vector<16x4xf32>, vector<16x4xf32>, vector<16x4xf32> -> vector<16x36xf32>
    %56 = vector.extract_strided_slice %13 {offsets = [0, 0], sizes = [16, 4], strides = [1, 1]} : vector<18x4xf32> to vector<16x4xf32>
    %57 = vector.extract_strided_slice %13 {offsets = [1, 0], sizes = [16, 4], strides = [1, 1]} : vector<18x4xf32> to vector<16x4xf32>
    %58 = vector.extract_strided_slice %13 {offsets = [2, 0], sizes = [16, 4], strides = [1, 1]} : vector<18x4xf32> to vector<16x4xf32>
    %59 = vector.extract_strided_slice %17 {offsets = [0, 0], sizes = [16, 4], strides = [1, 1]} : vector<18x4xf32> to vector<16x4xf32>
    %60 = vector.extract_strided_slice %17 {offsets = [1, 0], sizes = [16, 4], strides = [1, 1]} : vector<18x4xf32> to vector<16x4xf32>
    %61 = vector.extract_strided_slice %17 {offsets = [2, 0], sizes = [16, 4], strides = [1, 1]} : vector<18x4xf32> to vector<16x4xf32>
    %62 = vector.extract_strided_slice %21 {offsets = [0, 0], sizes = [16, 4], strides = [1, 1]} : vector<18x4xf32> to vector<16x4xf32>
    %63 = vector.extract_strided_slice %21 {offsets = [1, 0], sizes = [16, 4], strides = [1, 1]} : vector<18x4xf32> to vector<16x4xf32>
    %64 = vector.extract_strided_slice %21 {offsets = [2, 0], sizes = [16, 4], strides = [1, 1]} : vector<18x4xf32> to vector<16x4xf32>
    %65 = tpu.concatenate %56, %57, %58, %59, %60, %61, %62, %63, %64 in 1 : vector<16x4xf32>, vector<16x4xf32>, vector<16x4xf32>, vector<16x4xf32>, vector<16x4xf32>, vector<16x4xf32>, vector<16x4xf32>, vector<16x4xf32>, vector<16x4xf32> -> vector<16x36xf32>
    %66 = vector.extract_strided_slice %17 {offsets = [0, 0], sizes = [16, 4], strides = [1, 1]} : vector<18x4xf32> to vector<16x4xf32>
    %67 = vector.extract_strided_slice %17 {offsets = [1, 0], sizes = [16, 4], strides = [1, 1]} : vector<18x4xf32> to vector<16x4xf32>
    %68 = vector.extract_strided_slice %17 {offsets = [2, 0], sizes = [16, 4], strides = [1, 1]} : vector<18x4xf32> to vector<16x4xf32>
    %69 = vector.extract_strided_slice %21 {offsets = [0, 0], sizes = [16, 4], strides = [1, 1]} : vector<18x4xf32> to vector<16x4xf32>
    %70 = vector.extract_strided_slice %21 {offsets = [1, 0], sizes = [16, 4], strides = [1, 1]} : vector<18x4xf32> to vector<16x4xf32>
    %71 = vector.extract_strided_slice %21 {offsets = [2, 0], sizes = [16, 4], strides = [1, 1]} : vector<18x4xf32> to vector<16x4xf32>
    %72 = vector.extract_strided_slice %25 {offsets = [0, 0], sizes = [16, 4], strides = [1, 1]} : vector<18x4xf32> to vector<16x4xf32>
    %73 = vector.extract_strided_slice %25 {offsets = [1, 0], sizes = [16, 4], strides = [1, 1]} : vector<18x4xf32> to vector<16x4xf32>
    %74 = vector.extract_strided_slice %25 {offsets = [2, 0], sizes = [16, 4], strides = [1, 1]} : vector<18x4xf32> to vector<16x4xf32>
    %75 = tpu.concatenate %66, %67, %68, %69, %70, %71, %72, %73, %74 in 1 : vector<16x4xf32>, vector<16x4xf32>, vector<16x4xf32>, vector<16x4xf32>, vector<16x4xf32>, vector<16x4xf32>, vector<16x4xf32>, vector<16x4xf32>, vector<16x4xf32> -> vector<16x36xf32>
    %76 = vector.extract_strided_slice %21 {offsets = [0, 0], sizes = [16, 4], strides = [1, 1]} : vector<18x4xf32> to vector<16x4xf32>
    %77 = vector.extract_strided_slice %21 {offsets = [1, 0], sizes = [16, 4], strides = [1, 1]} : vector<18x4xf32> to vector<16x4xf32>
    %78 = vector.extract_strided_slice %21 {offsets = [2, 0], sizes = [16, 4], strides = [1, 1]} : vector<18x4xf32> to vector<16x4xf32>
    %79 = vector.extract_strided_slice %25 {offsets = [0, 0], sizes = [16, 4], strides = [1, 1]} : vector<18x4xf32> to vector<16x4xf32>
    %80 = vector.extract_strided_slice %25 {offsets = [1, 0], sizes = [16, 4], strides = [1, 1]} : vector<18x4xf32> to vector<16x4xf32>
    %81 = vector.extract_strided_slice %25 {offsets = [2, 0], sizes = [16, 4], strides = [1, 1]} : vector<18x4xf32> to vector<16x4xf32>
    %82 = vector.extract_strided_slice %29 {offsets = [0, 0], sizes = [16, 4], strides = [1, 1]} : vector<18x4xf32> to vector<16x4xf32>
    %83 = vector.extract_strided_slice %29 {offsets = [1, 0], sizes = [16, 4], strides = [1, 1]} : vector<18x4xf32> to vector<16x4xf32>
    %84 = vector.extract_strided_slice %29 {offsets = [2, 0], sizes = [16, 4], strides = [1, 1]} : vector<18x4xf32> to vector<16x4xf32>
    %85 = tpu.concatenate %76, %77, %78, %79, %80, %81, %82, %83, %84 in 1 : vector<16x4xf32>, vector<16x4xf32>, vector<16x4xf32>, vector<16x4xf32>, vector<16x4xf32>, vector<16x4xf32>, vector<16x4xf32>, vector<16x4xf32>, vector<16x4xf32> -> vector<16x36xf32>
    %86 = vector.extract_strided_slice %25 {offsets = [0, 0], sizes = [16, 4], strides = [1, 1]} : vector<18x4xf32> to vector<16x4xf32>
    %87 = vector.extract_strided_slice %25 {offsets = [1, 0], sizes = [16, 4], strides = [1, 1]} : vector<18x4xf32> to vector<16x4xf32>
    %88 = vector.extract_strided_slice %25 {offsets = [2, 0], sizes = [16, 4], strides = [1, 1]} : vector<18x4xf32> to vector<16x4xf32>
    %89 = vector.extract_strided_slice %29 {offsets = [0, 0], sizes = [16, 4], strides = [1, 1]} : vector<18x4xf32> to vector<16x4xf32>
    %90 = vector.extract_strided_slice %29 {offsets = [1, 0], sizes = [16, 4], strides = [1, 1]} : vector<18x4xf32> to vector<16x4xf32>
    %91 = vector.extract_strided_slice %29 {offsets = [2, 0], sizes = [16, 4], strides = [1, 1]} : vector<18x4xf32> to vector<16x4xf32>
    %92 = vector.extract_strided_slice %33 {offsets = [0, 0], sizes = [16, 4], strides = [1, 1]} : vector<18x4xf32> to vector<16x4xf32>
    %93 = vector.extract_strided_slice %33 {offsets = [1, 0], sizes = [16, 4], strides = [1, 1]} : vector<18x4xf32> to vector<16x4xf32>
    %94 = vector.extract_strided_slice %33 {offsets = [2, 0], sizes = [16, 4], strides = [1, 1]} : vector<18x4xf32> to vector<16x4xf32>
    %95 = tpu.concatenate %86, %87, %88, %89, %90, %91, %92, %93, %94 in 1 : vector<16x4xf32>, vector<16x4xf32>, vector<16x4xf32>, vector<16x4xf32>, vector<16x4xf32>, vector<16x4xf32>, vector<16x4xf32>, vector<16x4xf32>, vector<16x4xf32> -> vector<16x36xf32>
    %96 = vector.extract_strided_slice %29 {offsets = [0, 0], sizes = [16, 4], strides = [1, 1]} : vector<18x4xf32> to vector<16x4xf32>
    %97 = vector.extract_strided_slice %29 {offsets = [1, 0], sizes = [16, 4], strides = [1, 1]} : vector<18x4xf32> to vector<16x4xf32>
    %98 = vector.extract_strided_slice %29 {offsets = [2, 0], sizes = [16, 4], strides = [1, 1]} : vector<18x4xf32> to vector<16x4xf32>
    %99 = vector.extract_strided_slice %33 {offsets = [0, 0], sizes = [16, 4], strides = [1, 1]} : vector<18x4xf32> to vector<16x4xf32>
    %100 = vector.extract_strided_slice %33 {offsets = [1, 0], sizes = [16, 4], strides = [1, 1]} : vector<18x4xf32> to vector<16x4xf32>
    %101 = vector.extract_strided_slice %33 {offsets = [2, 0], sizes = [16, 4], strides = [1, 1]} : vector<18x4xf32> to vector<16x4xf32>
    %102 = vector.extract_strided_slice %37 {offsets = [0, 0], sizes = [16, 4], strides = [1, 1]} : vector<18x4xf32> to vector<16x4xf32>
    %103 = vector.extract_strided_slice %37 {offsets = [1, 0], sizes = [16, 4], strides = [1, 1]} : vector<18x4xf32> to vector<16x4xf32>
    %104 = vector.extract_strided_slice %37 {offsets = [2, 0], sizes = [16, 4], strides = [1, 1]} : vector<18x4xf32> to vector<16x4xf32>
    %105 = tpu.concatenate %96, %97, %98, %99, %100, %101, %102, %103, %104 in 1 : vector<16x4xf32>, vector<16x4xf32>, vector<16x4xf32>, vector<16x4xf32>, vector<16x4xf32>, vector<16x4xf32>, vector<16x4xf32>, vector<16x4xf32>, vector<16x4xf32> -> vector<16x36xf32>
    %106 = vector.extract_strided_slice %33 {offsets = [0, 0], sizes = [16, 4], strides = [1, 1]} : vector<18x4xf32> to vector<16x4xf32>
    %107 = vector.extract_strided_slice %33 {offsets = [1, 0], sizes = [16, 4], strides = [1, 1]} : vector<18x4xf32> to vector<16x4xf32>
    %108 = vector.extract_strided_slice %33 {offsets = [2, 0], sizes = [16, 4], strides = [1, 1]} : vector<18x4xf32> to vector<16x4xf32>
    %109 = vector.extract_strided_slice %37 {offsets = [0, 0], sizes = [16, 4], strides = [1, 1]} : vector<18x4xf32> to vector<16x4xf32>
    %110 = vector.extract_strided_slice %37 {offsets = [1, 0], sizes = [16, 4], strides = [1, 1]} : vector<18x4xf32> to vector<16x4xf32>
    %111 = vector.extract_strided_slice %37 {offsets = [2, 0], sizes = [16, 4], strides = [1, 1]} : vector<18x4xf32> to vector<16x4xf32>
    %112 = vector.extract_strided_slice %41 {offsets = [0, 0], sizes = [16, 4], strides = [1, 1]} : vector<18x4xf32> to vector<16x4xf32>
    %113 = vector.extract_strided_slice %41 {offsets = [1, 0], sizes = [16, 4], strides = [1, 1]} : vector<18x4xf32> to vector<16x4xf32>
    %114 = vector.extract_strided_slice %41 {offsets = [2, 0], sizes = [16, 4], strides = [1, 1]} : vector<18x4xf32> to vector<16x4xf32>
    %115 = tpu.concatenate %106, %107, %108, %109, %110, %111, %112, %113, %114 in 1 : vector<16x4xf32>, vector<16x4xf32>, vector<16x4xf32>, vector<16x4xf32>, vector<16x4xf32>, vector<16x4xf32>, vector<16x4xf32>, vector<16x4xf32>, vector<16x4xf32> -> vector<16x36xf32>
    %116 = vector.extract_strided_slice %37 {offsets = [0, 0], sizes = [16, 4], strides = [1, 1]} : vector<18x4xf32> to vector<16x4xf32>
    %117 = vector.extract_strided_slice %37 {offsets = [1, 0], sizes = [16, 4], strides = [1, 1]} : vector<18x4xf32> to vector<16x4xf32>
    %118 = vector.extract_strided_slice %37 {offsets = [2, 0], sizes = [16, 4], strides = [1, 1]} : vector<18x4xf32> to vector<16x4xf32>
    %119 = vector.extract_strided_slice %41 {offsets = [0, 0], sizes = [16, 4], strides = [1, 1]} : vector<18x4xf32> to vector<16x4xf32>
    %120 = vector.extract_strided_slice %41 {offsets = [1, 0], sizes = [16, 4], strides = [1, 1]} : vector<18x4xf32> to vector<16x4xf32>
    %121 = vector.extract_strided_slice %41 {offsets = [2, 0], sizes = [16, 4], strides = [1, 1]} : vector<18x4xf32> to vector<16x4xf32>
    %122 = vector.extract_strided_slice %45 {offsets = [0, 0], sizes = [16, 4], strides = [1, 1]} : vector<18x4xf32> to vector<16x4xf32>
    %123 = vector.extract_strided_slice %45 {offsets = [1, 0], sizes = [16, 4], strides = [1, 1]} : vector<18x4xf32> to vector<16x4xf32>
    %124 = vector.extract_strided_slice %45 {offsets = [2, 0], sizes = [16, 4], strides = [1, 1]} : vector<18x4xf32> to vector<16x4xf32>
    %125 = tpu.concatenate %116, %117, %118, %119, %120, %121, %122, %123, %124 in 1 : vector<16x4xf32>, vector<16x4xf32>, vector<16x4xf32>, vector<16x4xf32>, vector<16x4xf32>, vector<16x4xf32>, vector<16x4xf32>, vector<16x4xf32>, vector<16x4xf32> -> vector<16x36xf32>
    %126 = tpu.concatenate %55, %65, %75, %85, %95, %105, %115, %125 in 0 : vector<16x36xf32>, vector<16x36xf32>, vector<16x36xf32>, vector<16x36xf32>, vector<16x36xf32>, vector<16x36xf32>, vector<16x36xf32>, vector<16x36xf32> -> vector<128x36xf32>
    %c0_33 = arith.constant 0 : index
    %c0_34 = arith.constant 0 : index
    %127 = vector.load %arg3[%c0_33, %c0_34] : memref<36x8xf32, #tpu.memory_space<vmem>>, vector<36x8xf32>
    %cst = arith.constant dense<0.000000e+00> : vector<128x8xf32>
    %128 = tpu.matmul %126, %127, %cst {dimension_numbers = #tpu.dot_dimension_numbers<[1], [0], [0], [1], [0, 0, 1, 1], [], []>} : vector<128x36xf32>, vector<36x8xf32>, vector<128x8xf32> -> vector<128x8xf32>
    %c0_35 = arith.constant 0 : index
    %c0_36 = arith.constant 0 : index
    %129 = vector.load %arg4[%c0_35, %c0_36] : memref<128x8xf32, #tpu.memory_space<vmem>>, vector<128x8xf32>
    tpu.vector_store %arg4[%c0_35, %c0_36], %128 {strides = array<i32>} : memref<128x8xf32, #tpu.memory_space<vmem>>, vector<128x8xf32>,
    %cst_37 = arith.constant dense<0.000000e+00> : vector<8xf32>
    %130 = vector.multi_reduction <add>, %128, %cst_37 [0] : vector<128x8xf32> to vector<8xf32>
    %131 = vector.shape_cast %130 : vector<8xf32> to vector<1x8xf32>
    %132 = arith.mulf %128, %128 : vector<128x8xf32>
    %cst_38 = arith.constant dense<0.000000e+00> : vector<8xf32>
    %133 = vector.multi_reduction <add>, %132, %cst_38 [0] : vector<128x8xf32> to vector<8xf32>
    %134 = vector.shape_cast %133 : vector<8xf32> to vector<1x8xf32>
    %c0_39 = arith.constant 0 : index
    %c0_40 = arith.constant 0 : index
    %135 = vector.load %arg5[%c0_39, %c0_40] : memref<2x8xf32, #tpu.memory_space<vmem>>, vector<2x8xf32>
    %136 = tpu.concatenate %131, %134 in 0 : vector<1x8xf32>, vector<1x8xf32> -> vector<2x8xf32>
    %137 = arith.addf %135, %136 : vector<2x8xf32>
    %c0_41 = arith.constant 0 : index
    %c0_42 = arith.constant 0 : index
    %138 = vector.load %arg5[%c0_41, %c0_42] : memref<2x8xf32, #tpu.memory_space<vmem>>, vector<2x8xf32>
    tpu.vector_store %arg5[%c0_41, %c0_42], %137 {strides = array<i32>} : memref<2x8xf32, #tpu.memory_space<vmem>>, vector<2x8xf32>,
    return
  }
  func.func @transform_0(%arg0: i32, %arg1: i32) -> (i32, i32, i32, i32) {
    %c0_i32 = arith.constant 0 : i32
    %c0_i32_0 = arith.constant 0 : i32
    %c0_i32_1 = arith.constant 0 : i32
    %c0_i32_2 = arith.constant 0 : i32
    return %arg0, %c0_i32, %c0_i32_0, %c0_i32_1 : i32, i32, i32, i32
  }
  func.func @transform_1(%arg0: i32, %arg1: i32) -> (i32, i32) {
    %c0_i32 = arith.constant 0 : i32
    %c0_i32_0 = arith.constant 0 : i32
    %c0_i32_1 = arith.constant 0 : i32
    return %c0_i32, %c0_i32_0 : i32, i32
  }
  func.func @transform_2(%arg0: i32, %arg1: i32) -> (i32, i32) {
    %c2_i32 = arith.constant 2 : i32
    %0 = arith.muli %arg0, %c2_i32 : i32
    %1 = arith.addi %0, %arg1 : i32
    %c0_i32 = arith.constant 0 : i32
    %c0_i32_0 = arith.constant 0 : i32
    return %1, %c0_i32 : i32, i32
  }
  func.func @transform_3(%arg0: i32, %arg1: i32) -> (i32, i32) {
    %c0_i32 = arith.constant 0 : i32
    %c0_i32_0 = arith.constant 0 : i32
    %c0_i32_1 = arith.constant 0 : i32
    return %c0_i32, %c0_i32_0 : i32, i32
  }
}

module attributes {stable_mosaic.version = 11 : i64} {
  func.func @_bn_affine_relu_kernel(%arg0: i32, %arg1: memref<128x8xf32, #tpu.memory_space<vmem>>, %arg2: memref<2x8xf32, #tpu.memory_space<vmem>>, %arg3: memref<1x8xf32, #tpu.memory_space<vmem>>, %arg4: memref<1x8xf32, #tpu.memory_space<vmem>>, %arg5: memref<128x8xf32, #tpu.memory_space<vmem>>) attributes {dimension_semantics = [#tpu.dimension_semantics<parallel>], iteration_bounds = array<i64: 4>, scalar_prefetch = 0 : i64, scratch_operands = 0 : i64, tpu.core_type = #tpu.core_type<tc>, window_params = [{transform_indices = @transform_0, window_bounds = array<i64: 128, 8>}, {pipeline_mode = #tpu.pipeline_mode<synchronous>, transform_indices = @transform_1, window_bounds = array<i64: 2, 8>}, {pipeline_mode = #tpu.pipeline_mode<synchronous>, transform_indices = @transform_2, window_bounds = array<i64: 1, 8>}, {pipeline_mode = #tpu.pipeline_mode<synchronous>, transform_indices = @transform_3, window_bounds = array<i64: 1, 8>}, {transform_indices = @transform_4, window_bounds = array<i64: 128, 8>}]} {
    %c0 = arith.constant 0 : index
    %c0_0 = arith.constant 0 : index
    %0 = vector.load %arg2[%c0, %c0_0] : memref<2x8xf32, #tpu.memory_space<vmem>>, vector<1x8xf32>
    %c1 = arith.constant 1 : index
    %c0_1 = arith.constant 0 : index
    %1 = vector.load %arg2[%c1, %c0_1] : memref<2x8xf32, #tpu.memory_space<vmem>>, vector<1x8xf32>
    %cst = arith.constant 0.001953125 : f32
    %2 = vector.broadcast %cst : f32 to vector<1x8xf32>
    %3 = arith.mulf %0, %2 : vector<1x8xf32>
    %cst_2 = arith.constant 0.001953125 : f32
    %4 = vector.broadcast %cst_2 : f32 to vector<1x8xf32>
    %5 = arith.mulf %1, %4 : vector<1x8xf32>
    %6 = arith.mulf %3, %3 : vector<1x8xf32>
    %7 = arith.subf %5, %6 : vector<1x8xf32>
    %cst_3 = arith.constant 0.000000e+00 : f32
    %8 = vector.broadcast %cst_3 : f32 to vector<1x8xf32>
    %9 = arith.maximumf %7, %8 : vector<1x8xf32>
    %cst_4 = arith.constant 9.99999974E-6 : f32
    %10 = vector.broadcast %cst_4 : f32 to vector<1x8xf32>
    %11 = arith.addf %9, %10 : vector<1x8xf32>
    %12 = math.rsqrt %11 : vector<1x8xf32>
    %c0_5 = arith.constant 0 : index
    %c0_6 = arith.constant 0 : index
    %13 = vector.load %arg3[%c0_5, %c0_6] : memref<1x8xf32, #tpu.memory_space<vmem>>, vector<1x8xf32>
    %14 = arith.mulf %13, %12 : vector<1x8xf32>
    %c0_7 = arith.constant 0 : index
    %c0_8 = arith.constant 0 : index
    %15 = vector.load %arg4[%c0_7, %c0_8] : memref<1x8xf32, #tpu.memory_space<vmem>>, vector<1x8xf32>
    %16 = arith.mulf %3, %14 : vector<1x8xf32>
    %17 = arith.subf %15, %16 : vector<1x8xf32>
    %c0_9 = arith.constant 0 : index
    %c0_10 = arith.constant 0 : index
    %18 = vector.load %arg1[%c0_9, %c0_10] : memref<128x8xf32, #tpu.memory_space<vmem>>, vector<128x8xf32>
    %19 = vector.broadcast %14 : vector<1x8xf32> to vector<128x8xf32>
    %20 = arith.mulf %18, %19 : vector<128x8xf32>
    %21 = vector.broadcast %17 : vector<1x8xf32> to vector<128x8xf32>
    %22 = arith.addf %20, %21 : vector<128x8xf32>
    %cst_11 = arith.constant 0.000000e+00 : f32
    %23 = vector.broadcast %cst_11 : f32 to vector<128x8xf32>
    %24 = arith.maximumf %22, %23 : vector<128x8xf32>
    %c0_12 = arith.constant 0 : index
    %c0_13 = arith.constant 0 : index
    %25 = vector.load %arg5[%c0_12, %c0_13] : memref<128x8xf32, #tpu.memory_space<vmem>>, vector<128x8xf32>
    tpu.vector_store %arg5[%c0_12, %c0_13], %24 {strides = array<i32>} : memref<128x8xf32, #tpu.memory_space<vmem>>, vector<128x8xf32>,
    return
  }
  func.func @transform_0(%arg0: i32) -> (i32, i32) {
    %c0_i32 = arith.constant 0 : i32
    %c0_i32_0 = arith.constant 0 : i32
    return %arg0, %c0_i32 : i32, i32
  }
  func.func @transform_1(%arg0: i32) -> (i32, i32) {
    %c0_i32 = arith.constant 0 : i32
    %c0_i32_0 = arith.constant 0 : i32
    %c0_i32_1 = arith.constant 0 : i32
    return %c0_i32, %c0_i32_0 : i32, i32
  }
  func.func @transform_2(%arg0: i32) -> (i32, i32) {
    %c0_i32 = arith.constant 0 : i32
    %c0_i32_0 = arith.constant 0 : i32
    %c0_i32_1 = arith.constant 0 : i32
    return %c0_i32, %c0_i32_0 : i32, i32
  }
  func.func @transform_3(%arg0: i32) -> (i32, i32) {
    %c0_i32 = arith.constant 0 : i32
    %c0_i32_0 = arith.constant 0 : i32
    %c0_i32_1 = arith.constant 0 : i32
    return %c0_i32, %c0_i32_0 : i32, i32
  }
  func.func @transform_4(%arg0: i32) -> (i32, i32) {
    %c0_i32 = arith.constant 0 : i32
    %c0_i32_0 = arith.constant 0 : i32
    return %arg0, %c0_i32 : i32, i32
  }
}

</mosaic_0001>

<bundles_post_ra>
// kernel: conv_block.3
= control target key start
LH: loop header
LB: loop body
LE: loop exit
PB: predicated region body
PF: predicated region fallthrough
CT: control target
= control target key end

     0   :  { %s418_s15 = smov 0   ;;  %s506_s0 = inlined_call_operand.vmem [shape: f32[512,8], index: 0, kind: input, shape index: {}]   ;;  %s507_s1 = inlined_call_operand.vmem [shape: f32[2,8], index: 1, kind: input, shape index: {}]   ;;  %s508_s2 = inlined_call_operand.vmem [shape: f32[1,8], index: 2, kind: input, shape index: {}]   ;;  %s509_s3 = inlined_call_operand.vmem [shape: f32[1,8], index: 3, kind: input, shape index: {}]   ;;  %s510_s4 = inlined_call_operand.vmem [shape: f32[512,8], index: 4, kind: output, shape index: {}]  }
   0x1 LB: > { %s364_s16 = sadd.s32 4294967295, %s391_s15   ;;  %p368_p0 = scmp.ge.s32.totalorder %s391_s15, 1  ;;  %s391_s15 = sphi %s418_s15, %s14_s15  }
   0x2   : > { %p163_p1 = scmp.lt.s32.totalorder %s391_s15, 5 }
   0x4   : > { %p164_p2 = pnand %p368_p0, %p163_p1 }
   0x5   : > { %v201_v0 = vld [vmem:[%s507_s1] sm:$0x1] (!%p164_p2)  ;;  %v202_v1 = vld [vmem:[%s507_s1 + $0x1] sm:$0x1] (!%p164_p2)  ;;  %s369_s21 = sshll.u32 (!%p164_p2), %s364_s16, 4  ;;  %v232_v8 = vlaneseq (!%p164_p2)  ;;  %vm291_vm0 = vcmask (!%p164_p2), 64512  }
   0x6   : > { %167 = sbr.rel (%p164_p2) target bundleno = 48 (0x30), region = 36  ;;  %v203_v2 = vmul.f32 (!%p164_p2), 0.001953125, %v201_v0  ;;  %v204_v3 = vmul.f32 (!%p164_p2), 0.001953125, %v202_v1  ;;  %p190_p3 = scmp.lt.s32.totalorder (!%p164_p2), %s369_s21, 63  ;;  %v210_v10 = vld [vmem:[%s508_s2] sm:$0x1] (!%p164_p2) }
   0x7   : > { %v233_v9 = vshrl.u32 (!%p164_p2), %v232_v8, 7  ;;  %v212_v14 = vld [vmem:[%s509_s3] sm:$0x1] (!%p164_p2) }
   0x8   : > { %v205_v4 = vmul.f32 (!%p164_p2), %v203_v2, %v203_v2 }
   0x9   : > { %v234_v11 = vsub.s32 (!%p164_p2), 0, %v233_v9 }
   0xa   : > { %v206_v5 = vsub.f32 (!%p164_p2), %v204_v3, %v205_v4 }
   0xc   : > { %v207_v6 = vmax.f32 (!%p164_p2), %v206_v5, 0.0 }
   0xd   : > { %s512_s21 = smov (!%p190_p3, %s369_s21), 63 }
   0xe   : > { %v208_v7 = vadd.f32 1e-05, %v207_v6  ;;  %s370_s22 = sshll.u32 %s512_s21, 3 }
   0xf   : > { %s440_s25 = scalar_lea.vmem %s506_s0, %s370_s22  ;;  %s467_s6 = scalar_lea.vmem %s510_s4, %s370_s22 }
  0x10   : > { %383 = vrsqrt.f32 %v208_v7  ;;  %v215_v15 = vld [vmem:[%s440_s25] sm:$0xff]  ;;  %v216_v16 = vld [vmem:[%s440_s25 + $0x8] sm:$0xff]  ;;  %v217_v17 = vld [vmem:[%s440_s25 + $0x10] sm:$0xff] }
  0x11   : > { %v218_v18 = vld [vmem:[%s440_s25 + $0x18] sm:$0xff]  ;;  %v219_v19 = vld [vmem:[%s440_s25 + $0x20] sm:$0xff]  ;;  %v220_v22 = vld [vmem:[%s440_s25 + $0x28] sm:$0xff] }
  0x12   : > { %v221_v23 = vld [vmem:[%s440_s25 + $0x30] sm:$0xff]  ;;  %v222_v24 = vld [vmem:[%s440_s25 + $0x38] sm:$0xff]  ;;  %v223_v25 = vld [vmem:[%s440_s25 + $0x40] sm:$0xff] }
  0x13   : > { %v224_v26 = vld [vmem:[%s440_s25 + $0x48] sm:$0xff]  ;;  %v225_v27 = vld [vmem:[%s440_s25 + $0x50] sm:$0xff]  ;;  %v226_v32 = vld [vmem:[%s440_s25 + $0x58] sm:$0xff] }
  0x14   : > { %v227_v33 = vld [vmem:[%s440_s25 + $0x60] sm:$0xff]  ;;  %v228_v34 = vld [vmem:[%s440_s25 + $0x68] sm:$0xff]  ;;  %v229_v59 = vld [vmem:[%s440_s25 + $0x70] sm:$0xff] }
  0x15   : > { %v230_v60 = vld [vmem:[%s440_s25 + $0x78] sm:$0xff] }
  0x1a   : > { %v384_v12 = vpop.eup %383 }
  0x1b   : > { %v211_v13 = vmul.f32 %v384_v12, %v210_v10 }
  0x1d   : > { %v213_v20 = vmul.f32 %v211_v13, %v203_v2  ;;  %v235_v21 = vrot.slane %v211_v13, %v234_v11 }
  0x1f   : > { %v214_v28 = vsub.f32 %v212_v14, %v213_v20  ;;  %v237_v29 = vmul.f32 %v235_v21, %v215_v15  ;;  %v238_v30 = vmul.f32 %v235_v21, %v216_v16  ;;  %v239_v31 = vmul.f32 %v235_v21, %v217_v17 }
  0x20   : > { %v240_v35 = vmul.f32 %v235_v21, %v218_v18  ;;  %v241_v36 = vmul.f32 %v235_v21, %v219_v19  ;;  %v242_v37 = vmul.f32 %v235_v21, %v220_v22  ;;  %v243_v38 = vmul.f32 %v235_v21, %v221_v23 }
  0x21   : > { %v257_v39 = vrot.slane %v214_v28, %v234_v11  ;;  %v244_v40 = vmul.f32 %v235_v21, %v222_v24  ;;  %v245_v41 = vmul.f32 %v235_v21, %v223_v25  ;;  %v246_v42 = vmul.f32 %v235_v21, %v224_v26 }
  0x22   : > { %v247_v43 = vmul.f32 %v235_v21, %v225_v27  ;;  %v248_v44 = vmul.f32 %v235_v21, %v226_v32  ;;  %v249_v45 = vmul.f32 %v235_v21, %v227_v33  ;;  %v250_v46 = vmul.f32 %v235_v21, %v228_v34 }
  0x23   : > { %v259_v47 = vadd.f32 %v257_v39, %v237_v29  ;;  %v260_v48 = vadd.f32 %v257_v39, %v238_v30  ;;  %v261_v49 = vadd.f32 %v257_v39, %v239_v31  ;;  %v262_v50 = vadd.f32 %v257_v39, %v240_v35 }
  0x24   : > { %v263_v51 = vadd.f32 %v257_v39, %v241_v36  ;;  %v264_v52 = vadd.f32 %v257_v39, %v242_v37  ;;  %v265_v53 = vadd.f32 %v257_v39, %v243_v38  ;;  %v266_v54 = vadd.f32 %v257_v39, %v244_v40 }
  0x25   : > { %v275_v55 = vmax.f32 %v259_v47, 0.0  ;;  %v276_v56 = vmax.f32 %v260_v48, 0.0  ;;  %v277_v57 = vmax.f32 %v261_v49, 0.0  ;;  %v278_v58 = vmax.f32 %v262_v50, 0.0 }
  0x26   : > { %v279_v61 = vmax.f32 %v263_v51, 0.0  ;;  %v280_v62 = vmax.f32 %v264_v52, 0.0  ;;  %v281_v63 = vmax.f32 %v265_v53, 0.0  ;;  %v282_v0 = vmax.f32 %v266_v54, 0.0 }
  0x27   : > { %292 = vst.msk [vmem:[%s467_s6] sm:$0xff] %vm291_vm0, %v275_v55  ;;  %293 = vst.msk [vmem:[%s467_s6 + $0x8] sm:$0xff] %vm291_vm0, %v276_v56  ;;  %v267_v1 = vadd.f32 %v257_v39, %v245_v41  ;;  %v268_v2 = vadd.f32 %v257_v39, %v246_v42  ;;  %v269_v3 = vadd.f32 %v257_v39, %v247_v43 }
  0x28   : > { %294 = vst.msk [vmem:[%s467_s6 + $0x10] sm:$0xff] %vm291_vm0, %v277_v57  ;;  %295 = vst.msk [vmem:[%s467_s6 + $0x18] sm:$0xff] %vm291_vm0, %v278_v58  ;;  %v270_v4 = vadd.f32 %v257_v39, %v248_v44  ;;  %v271_v5 = vadd.f32 %v257_v39, %v249_v45  ;;  %v272_v6 = vadd.f32 %v257_v39, %v250_v46 }
  0x29   : > { %296 = vst.msk [vmem:[%s467_s6 + $0x20] sm:$0xff] %vm291_vm0, %v279_v61  ;;  %297 = vst.msk [vmem:[%s467_s6 + $0x28] sm:$0xff] %vm291_vm0, %v280_v62  ;;  %v251_v7 = vmul.f32 %v235_v21, %v229_v59  ;;  %v252_v8 = vmul.f32 %v235_v21, %v230_v60  ;;  %v283_v9 = vmax.f32 %v267_v1, 0.0  ;;  %v284_v10 = vmax.f32 %v268_v2, 0.0 }
  0x2a   : > { %298 = vst.msk [vmem:[%s467_s6 + $0x30] sm:$0xff] %vm291_vm0, %v281_v63  ;;  %299 = vst.msk [vmem:[%s467_s6 + $0x38] sm:$0xff] %vm291_vm0, %v282_v0  ;;  %v285_v11 = vmax.f32 %v269_v3, 0.0  ;;  %v286_v12 = vmax.f32 %v270_v4, 0.0  ;;  %v287_v13 = vmax.f32 %v271_v5, 0.0  ;;  %v288_v14 = vmax.f32 %v272_v6, 0.0 }
  0x2b   : > { %v273_v15 = vadd.f32 %v257_v39, %v251_v7  ;;  %v274_v16 = vadd.f32 %v257_v39, %v252_v8  ;;  %300 = vst.msk [vmem:[%s467_s6 + $0x40] sm:$0xff] %vm291_vm0, %v283_v9  ;;  %301 = vst.msk [vmem:[%s467_s6 + $0x48] sm:$0xff] %vm291_vm0, %v284_v10 }
  0x2c   : > { %302 = vst.msk [vmem:[%s467_s6 + $0x50] sm:$0xff] %vm291_vm0, %v285_v11  ;;  %303 = vst.msk [vmem:[%s467_s6 + $0x58] sm:$0xff] %vm291_vm0, %v286_v12 }
  0x2d   : > { %304 = vst.msk [vmem:[%s467_s6 + $0x60] sm:$0xff] %vm291_vm0, %v287_v13  ;;  %305 = vst.msk [vmem:[%s467_s6 + $0x68] sm:$0xff] %vm291_vm0, %v288_v14  ;;  %v289_v17 = vmax.f32 %v273_v15, 0.0  ;;  %v290_v18 = vmax.f32 %v274_v16, 0.0 }
  0x2f   : > { %306 = vst.msk [vmem:[%s467_s6 + $0x70] sm:$0xff] %vm291_vm0, %v289_v17  ;;  %307 = vst.msk [vmem:[%s467_s6 + $0x78] sm:$0xff] %vm291_vm0, %v290_v18 }
  0x30 PF: > { %s14_s15 = sadd.s32 1, %s391_s15  }
  0x31   : > { %p11_p4 = scmp.ge.s32.totalorder %s14_s15, 6  }
  0x33   :  { %13 = sbr.rel (!%p11_p4) target bundleno = 1 (0x1), region = 66 }

// kernel: conv_block.2
= control target key start
LH: loop header
LB: loop body
LE: loop exit
PB: predicated region body
PF: predicated region fallthrough
CT: control target
= control target key end

     0   :  { %s1610_s12 = smov 0   ;;  %s1612_s13 = smov 0   ;;  %s2269_s0 = inlined_call_operand.vmem [shape: f32[2,18,18,4], index: 0, kind: input, shape index: {}]   ;;  %s2270_s1 = inlined_call_operand.vmem [shape: f32[36,8], index: 1, kind: input, shape index: {}]   ;;  %s2271_s2 = inlined_call_operand.vmem [shape: f32[512,8], index: 2, kind: output, shape index: {0}]   ;;  %s2272_s3 = inlined_call_operand.vmem [shape: f32[2,8], index: 3, kind: output, shape index: {1}]  }
   0x1   :  { %s1614_s14 = smov 0   ;;  %s1616_s15 = smov 0  }
   0x2   :  { %s1618_s16 = smov 0  }
   0x3 LB: > { %s23_s17 = sadd.s32 1, %s1571_s14  ;;  %s26_s18 = sadd.s32 1, %s1575_s15  ;;  %s1579_s16 = sphi %s1618_s16, %s14_s16   ;;  %s1575_s15 = sphi %s1616_s15, %s2276_s15   ;;  %s1571_s14 = sphi %s1614_s14, %s2275_s14   ;;  %s1567_s13 = sphi %s1612_s13, %s2274_s13   ;;  %s1563_s12 = sphi %s1610_s12, %s2273_s12  }
   0x4   : > { %p24_p0 = scmp.ge.s32.totalorder %s23_s17, 2  ;;  %p1351_p1 = scmp.ge.s32.totalorder %s1579_s16, 1 }
   0x5   : > { %p151_p2 = scmp.lt.s32.totalorder %s1579_s16, 5 }
   0x6   : > { %s2278_s17 = smov (%p24_p0, %s23_s17), 0  ;;  %s2280_s18 = smov (!%p24_p0, %s26_s18), %s1575_s15 }
   0x7   : > { %p152_p3 = pnand %p1351_p1, %p151_p2  ;;  %p28_p4 = scmp.ge.s32.totalorder %s2280_s18, 2 }
   0x8   : > { %p177_p5 = scmp.lt.s32.totalorder (!%p152_p3), %s1567_s13, 1  ;;  %s1353_s19 = sshll.u32 (!%p152_p3), %s1567_s13, 1 }
   0x9   : > { %s2282_s18 = smov (%p28_p4, %s2280_s18), 0  ;;  %155 = sbr.rel (%p152_p3) target bundleno = 637 (0x27d), region = 28 }
   0xa   : > { %s183_s20 = sadd.s32 (!%p152_p3), %s1563_s12, %s1353_s19  ;;  %p192_p6 = scmp.eq.s32.totalorder (!%p152_p3), %s1567_s13, 0 }
   0xb   : > { %s1354_s21 = sshll.u32 (!%p152_p3), %s183_s20, 4  ;;  %p193_p7 = scmp.eq.s32.totalorder (!%p152_p3), %s1563_s12, 0 }
   0xc   : > { %p185_p8 = scmp.lt.s32.totalorder (!%p152_p3), %s1354_s21, 63 }
   0xd   : > { %p194_p9 = pnand (!%p152_p3), %p193_p7, %p192_p6 }
  0x10   : > { %s2284_s13 = smov (!%p177_p5, %s1567_s13), 1  ;;  %s2286_s21 = smov (!%p185_p8, %s1354_s21), 63 }
  0x11   : > { %s1491_s22 = smul.u32 432, %s2284_s13  ;;  %s1355_s26 = sshll.u32 %s2286_s21, 3  ;;  %vm198_vm0 = vcmask (!%p194_p9), 58368   ;;  %v1581_v0 = vmov (!%p194_p9), 0.0  }
  0x12   : > { %s1650_s29 = scalar_lea.vmem %s2271_s2, %s1355_s26  ;;  %197 = sbr.rel (%p194_p9) target bundleno = 25 (0x19), region = 32  ;;  %199 = vst.msk [vmem:[%s2272_s3] sm:$0x3] (!%p194_p9), %vm198_vm0, %v1581_v0 }
  0x13   : > { %s181_s25 = scalar_lea.vmem %s2269_s0, %s1491_s22 }
  0x19 PF: > { %s1357_s5 = smul.u32 192, %s1563_s12  ;;  %vm275_vm1 = vcmask 1045504   ;;  %vm263_vm2 = vcmask 1046528   ;;  %s1582_s7 = smov 8   ;;  %v912_v29 = vld [vmem:[%s2270_s1] sm:$0xff]  ;;  %v913_v30 = vld [vmem:[%s2270_s1 + $0x8] sm:$0xff] }
  0x1a   : > { %s1583_s8 = smov 4   ;;  %s1584_s9 = smov 12   ;;  %v1477_v31 = vpack.c.bf16 %v913_v30, %v912_v29  ;;  %v914_v34 = vld [vmem:[%s2270_s1 + $0x10] sm:$0xff]  ;;  %v915_v35 = vld [vmem:[%s2270_s1 + $0x18] sm:$0xff]  ;;  %v916_v39 = vld [vmem:[%s2270_s1 + $0x20] sm:$0xf] }
  0x1b   : > { %s1656_s6 = scalar_lea.vmem %s181_s25, %s1357_s5  ;;  %s1585_s10 = smov 16   ;;  %v1481_v37 = vpack.c.bf16 %v915_v35, %v914_v34  ;;  %vm966_vm3 = vcmask 1043456   ;;  %vm349_vm4 = vcmask 31744   ;;  %vm352_vm5 = vcmask 64512  }
  0x1c   : > { %v1659_v1 = vld [vmem:[%s1656_s6] sm:$0xff]  ;;  %v1662_v2 = vld [vmem:[%s1656_s6 + $0x8] sm:$0xff]  ;;  %v205_v3 = vld [vmem:[%s1656_s6 + $0x10] sm:$0x3]  ;;  %s1586_s11 = smov 20   ;;  %s1587_s21 = smov 24   ;;  %1478 = vmatprep.subr.bf16.mxu0 %v1477_v31  ;;  %1485 = vmatprep.subr.bf16.mxu1 %v1477_v31 }
  0x1d   : > { %v276_v4 = vrot.slane %v1659_v1, 2  ;;  %v277_v5 = vrot.slane %v1662_v2, 2  ;;  %v264_v6 = vrot.slane %v1659_v1, 1  ;;  %v265_v7 = vrot.slane %v1662_v2, 1  ;;  %v1676_v14 = vld [vmem:[%s1656_s6 + $0x20] sm:$0xff]  ;;  %v1679_v15 = vld [vmem:[%s1656_s6 + $0x18] sm:$0xff]  ;;  %1480 = vmatpush3.bf16.msra.mxu0 %v1477_v31  ;;  %1488 = vmatpush3.bf16.msra.mxu1 %v1477_v31 }
  0x1e   : > { %v279_v8 = vrot.slane %v205_v3, 2  ;;  %v267_v9 = vrot.slane %v205_v3, 1  ;;  %v1362_v16 = vld [vmem:[%s1656_s6 + $0x28] sm:$0x3]  ;;  %v297_v17 = vrot.slane %v1676_v14, 1  ;;  %v296_v19 = vrot.slane %v1679_v15, 1  ;;  %1482 = vmatprep.subr.bf16.mxu0 %v1481_v37  ;;  %1486 = vmatprep.subr.bf16.mxu1 %v1481_v37 }
  0x1f   : > { %v278_v10 = vsel %vm275_vm1, %v276_v4, %v277_v5  ;;  %v266_v11 = vsel %vm263_vm2, %v264_v6, %v265_v7  ;;  %v299_v18 = vrot.slane %v1362_v16, 1  ;;  %v307_v22 = vrot.slane %v1679_v15, 2  ;;  %v1700_v26 = vld [vmem:[%s1656_s6 + $0x30] sm:$0xff]  ;;  %v1704_v28 = vld [vmem:[%s1656_s6 + $0x38] sm:$0xff]  ;;  %v1367_v38 = vld [vmem:[%s1656_s6 + $0x40] sm:$0x3] }
  0x20   : > { %281 = vrot.lane.b32.xlu1 %v278_v10, %s1582_s7  ;;  %269 = vrot.lane.b32.xlu0 %v266_v11, %s1583_s8  ;;  %v280_v12 = vsel %vm275_vm1, %v277_v5, %v279_v8  ;;  %v268_v13 = vsel %vm263_vm2, %v265_v7, %v267_v9  ;;  %v298_v21 = vsel %vm263_vm2, %v296_v19, %v297_v17  ;;  %v308_v23 = vrot.slane %v1676_v14, 2  ;;  %s1588_s26 = smov 28   ;;  %s1589_s30 = smov 32   ;;  %v1751_v47 = vld [vmem:[%s1656_s6 + $0x48] sm:$0xff]  ;;  %v1754_v48 = vld [vmem:[%s1656_s6 + $0x50] sm:$0xff] }
  0x21   : > { %v300_v20 = vsel %vm263_vm2, %v297_v17, %v299_v18  ;;  %v310_v25 = vrot.slane %v1362_v16, 2  ;;  %v327_v32 = vrot.slane %v1700_v26, 1  ;;  %v328_v33 = vrot.slane %v1704_v28, 1  ;;  %1484 = vmatpush3.bf16.msra.mxu0 %v1481_v37  ;;  %1489 = vmatpush3.bf16.msra.mxu1 %v1481_v37  ;;  %v1372_v52 = vld [vmem:[%s1656_s6 + $0x58] sm:$0x3]  ;;  %v1786_v60 = vld [vmem:[%s1656_s6 + $0x60] sm:$0xff] }
  0x22   : > { %v309_v24 = vsel %vm275_vm1, %v307_v22, %v308_v23  ;;  %v338_v40 = vrot.slane %v1700_v26, 2  ;;  %v339_v41 = vrot.slane %v1704_v28, 2  ;;  %v330_v42 = vrot.slane %v1367_v38, 1  ;;  %1451 = vmatprep.subr.msk.mxu0 %vm966_vm3, %v916_v39  ;;  %1487 = vmatprep.subr.msk.mxu1 %vm966_vm3, %v916_v39  ;;  %v1789_v61 = vld [vmem:[%s1656_s6 + $0x68] sm:$0xff]  ;;  %v1377_v3 = vld [vmem:[%s1656_s6 + $0x70] sm:$0x3] }
  0x23   : > { %v311_v27 = vsel %vm275_vm1, %v308_v23, %v310_v25  ;;  %v329_v36 = vsel %vm263_vm2, %v327_v32, %v328_v33  ;;  %v341_v45 = vrot.slane %v1367_v38, 2  ;;  %v412_v49 = vrot.slane %v1751_v47, 1  ;;  %v1821_v11 = vld [vmem:[%s1656_s6 + $0x78] sm:$0xff]  ;;  %v1824_v16 = vld [vmem:[%s1656_s6 + $0x80] sm:$0xff] }
  0x24   : > { %283 = vrot.lane.b32.xlu1 %v280_v12, %s1582_s7  ;;  %271 = vrot.lane.b32.xlu0 %v268_v13, %s1583_s8  ;;  %v340_v43 = vsel %vm275_vm1, %v338_v40, %v339_v41  ;;  %v331_v44 = vsel %vm263_vm2, %v328_v33, %v330_v42  ;;  %v413_v50 = vrot.slane %v1754_v48, 1  ;;  %v423_v53 = vrot.slane %v1751_v47, 2 }
  0x25   : > { %1452 = vmatpush3.msk.msra.mxu0 %vm966_vm3, %v916_v39  ;;  %1490 = vmatpush3.msk.msra.mxu1 %vm966_vm3, %v916_v39  ;;  %v342_v46 = vsel %vm275_vm1, %v339_v41, %v341_v45  ;;  %v424_v54 = vrot.slane %v1754_v48, 2  ;;  %v415_v55 = vrot.slane %v1372_v52, 1  ;;  %v426_v58 = vrot.slane %v1372_v52, 2 }
  0x26   : > { %v414_v51 = vsel %vm263_vm2, %v412_v49, %v413_v50  ;;  %v489_v62 = vrot.slane %v1786_v60, 1  ;;  %v490_v63 = vrot.slane %v1789_v61, 1  ;;  %v500_v4 = vrot.slane %v1786_v60, 2 }
  0x27   : > { %v425_v56 = vsel %vm275_vm1, %v423_v53, %v424_v54  ;;  %v416_v57 = vsel %vm263_vm2, %v413_v50, %v415_v55  ;;  %v427_v59 = vsel %vm275_vm1, %v424_v54, %v426_v58  ;;  %v501_v5 = vrot.slane %v1789_v61, 2 }
  0x28   : > { %291 = vrot.lane.b32.xlu1 %v1676_v14, %s1584_s9  ;;  %289 = vrot.lane.b32.xlu0 %v1679_v15, %s1584_s9  ;;  %v491_v0 = vsel %vm263_vm2, %v489_v62, %v490_v63  ;;  %v492_v6 = vrot.slane %v1377_v3, 1  ;;  %v503_v9 = vrot.slane %v1377_v3, 2  ;;  %v566_v17 = vrot.slane %v1821_v11, 1 }
  0x29   : > { %v502_v7 = vsel %vm275_vm1, %v500_v4, %v501_v5  ;;  %v567_v18 = vrot.slane %v1824_v16, 1  ;;  %v577_v25 = vrot.slane %v1821_v11, 2  ;;  %vm355_vm6 = vcmask 97280  }
  0x2a   : > { %v493_v8 = vsel %vm263_vm2, %v490_v63, %v492_v6  ;;  %v504_v10 = vsel %vm275_vm1, %v501_v5, %v503_v9  ;;  %vm358_vm7 = vcmask 130048   ;;  %vm361_vm8 = vcmask 162816   ;;  %v1387_v6 = vld [vmem:[%s1656_s6 + $0xa0] sm:$0x3] }
  0x2b   : > { %vm364_vm9 = vcmask 195584   ;;  %vm367_vm10 = vcmask 228352   ;;  %vm370_vm11 = vcmask 261120   ;;  %vm917_vm12 = vcmask 293888  }
  0x2c   : > { %303 = vrot.lane.b32.xlu1 %v300_v20, %s1585_s10  ;;  %301 = vrot.lane.b32.xlu0 %v298_v21, %s1585_s10  ;;  %vm1222_vm13 = vcmask 1040384   ;;  %vm1225_vm14 = vcmask 58368  }
  0x30   : > { %373 = vrot.lane.b32.xlu1 %v298_v21, %s1583_s8  ;;  %312 = vrot.lane.b32.xlu0 %v309_v24, %s1586_s11  ;;  %v568_v21 = vsel %vm263_vm2, %v566_v17, %v567_v18 }
  0x34   : > { %320 = vrot.lane.b32.xlu1 %v1700_v26, %s1587_s21  ;;  %314 = vrot.lane.b32.xlu0 %v311_v27, %s1586_s11 }
  0x38   : > { %379 = vrot.lane.b32.xlu1 %v309_v24, %s1582_s7  ;;  %375 = vrot.lane.b32.xlu0 %v300_v20, %s1583_s8  ;;  %v1382_v24 = vld [vmem:[%s1656_s6 + $0x88] sm:$0x3] }
  0x39   : > { %v569_v29 = vrot.slane %v1382_v24, 1 }
  0x3b   : > { %v570_v33 = vsel %vm263_vm2, %v567_v18, %v569_v29 }
  0x3c   : > { %332 = vrot.lane.b32.xlu1 %v329_v36, %s1588_s26  ;;  %322 = vrot.lane.b32.xlu0 %v1704_v28, %s1587_s21 }
  0x40   : > { %385 = vrot.lane.b32.xlu1 %v1700_v26, %s1584_s9  ;;  %381 = vrot.lane.b32.xlu0 %v311_v27, %s1582_s7  ;;  %v578_v27 = vrot.slane %v1824_v16, 2 }
  0x42   : > { %v579_v32 = vsel %vm275_vm1, %v577_v25, %v578_v27  ;;  %v657_v25 = vrot.slane %v1387_v6, 2 }
  0x44   : > { %343 = vrot.lane.b32.xlu1 %v340_v43, %s1589_s30  ;;  %334 = vrot.lane.b32.xlu0 %v331_v44, %s1588_s26 }
  0x48   : > { %391 = vrot.lane.b32.xlu1 %v329_v36, %s1585_s10  ;;  %387 = vrot.lane.b32.xlu0 %v1704_v28, %s1584_s9 }
  0x4c   : > { %393 = vrot.lane.b32.xlu1 %v331_v44, %s1585_s10  ;;  %345 = vrot.lane.b32.xlu0 %v342_v46, %s1589_s30 }
  0x50   : > { %450 = vrot.lane.b32.xlu1 %v329_v36, %s1583_s8  ;;  %397 = vrot.lane.b32.xlu0 %v340_v43, %s1586_s11  ;;  %v580_v36 = vrot.slane %v1382_v24, 2 }
  0x52   : > { %v581_v39 = vsel %vm275_vm1, %v578_v27, %v580_v36 }
  0x54   : > { %405 = vrot.lane.b32.xlu1 %v1751_v47, %s1587_s21  ;;  %399 = vrot.lane.b32.xlu0 %v342_v46, %s1586_s11 }
  0x58   : > { %456 = vrot.lane.b32.xlu1 %v340_v43, %s1582_s7  ;;  %452 = vrot.lane.b32.xlu0 %v331_v44, %s1583_s8 }
  0x5c   : > { %417 = vrot.lane.b32.xlu1 %v414_v51, %s1588_s26  ;;  %407 = vrot.lane.b32.xlu0 %v1754_v48, %s1587_s21 }
  0x60   : > { %462 = vrot.lane.b32.xlu1 %v1751_v47, %s1584_s9  ;;  %458 = vrot.lane.b32.xlu0 %v342_v46, %s1582_s7  ;;  %v1869_v46 = vld [vmem:[%s1656_s6 + $0x90] sm:$0xff] }
  0x61   : > { %v643_v55 = vrot.slane %v1869_v46, 1 }
  0x64   : > { %428 = vrot.lane.b32.xlu1 %v425_v56, %s1589_s30  ;;  %419 = vrot.lane.b32.xlu0 %v416_v57, %s1588_s26 }
  0x68   : > { %468 = vrot.lane.b32.xlu1 %v414_v51, %s1585_s10  ;;  %464 = vrot.lane.b32.xlu0 %v1754_v48, %s1584_s9 }
  0x6c   : > { %470 = vrot.lane.b32.xlu1 %v416_v57, %s1585_s10  ;;  %430 = vrot.lane.b32.xlu0 %v427_v59, %s1589_s30 }
  0x70   : > { %527 = vrot.lane.b32.xlu1 %v414_v51, %s1583_s8  ;;  %474 = vrot.lane.b32.xlu0 %v425_v56, %s1586_s11  ;;  %v1877_v51 = vld [vmem:[%s1656_s6 + $0x98] sm:$0xff] }
  0x74   : > { %482 = vrot.lane.b32.xlu1 %v1786_v60, %s1587_s21  ;;  %476 = vrot.lane.b32.xlu0 %v427_v59, %s1586_s11 }
  0x78   : > { %533 = vrot.lane.b32.xlu1 %v425_v56, %s1582_s7  ;;  %529 = vrot.lane.b32.xlu0 %v416_v57, %s1583_s8  ;;  %v644_v56 = vrot.slane %v1877_v51, 1 }
  0x7a   : > { %v645_v3 = vsel %vm263_vm2, %v643_v55, %v644_v56 }
  0x7c   : > { %494 = vrot.lane.b32.xlu1 %v491_v0, %s1588_s26  ;;  %484 = vrot.lane.b32.xlu0 %v1789_v61, %s1587_s21 }
  0x80   : > { %539 = vrot.lane.b32.xlu1 %v1786_v60, %s1584_s9  ;;  %535 = vrot.lane.b32.xlu0 %v427_v59, %s1582_s7 }
  0x84   : > { %505 = vrot.lane.b32.xlu1 %v502_v7, %s1589_s30  ;;  %496 = vrot.lane.b32.xlu0 %v493_v8, %s1588_s26 }
  0x88   : > { %545 = vrot.lane.b32.xlu1 %v491_v0, %s1585_s10  ;;  %541 = vrot.lane.b32.xlu0 %v1789_v61, %s1584_s9 }
  0x8c   : > { %547 = vrot.lane.b32.xlu1 %v493_v8, %s1585_s10  ;;  %507 = vrot.lane.b32.xlu0 %v504_v10, %s1589_s30 }
  0x90   : > { %604 = vrot.lane.b32.xlu1 %v491_v0, %s1583_s8  ;;  %551 = vrot.lane.b32.xlu0 %v502_v7, %s1586_s11 }
  0x92   : > { %v282_v12 = vpop.permute.xlu1 %281  ;;  %v270_v13 = vpop.permute.xlu0 %269 }
  0x93   : > { %v350_v42 = vsel %vm349_vm4, %v1659_v1, %v270_v13  ;;  %v646_v13 = vrot.slane %v1387_v6, 1 }
  0x94   : > { %559 = vrot.lane.b32.xlu1 %v1821_v11, %s1587_s21  ;;  %553 = vrot.lane.b32.xlu0 %v504_v10, %s1586_s11  ;;  %v353_v45 = vsel %vm352_vm5, %v350_v42, %v282_v12  ;;  %v655_v12 = vrot.slane %v1877_v51, 2 }
  0x96   : > { %v1831_v19 = vpop.permute.xlu1 %283  ;;  %v272_v20 = vpop.permute.xlu0 %271 }
  0x97   : > { %v351_v57 = vsel %vm349_vm4, %v1662_v2, %v272_v20 }
  0x98   : > { %610 = vrot.lane.b32.xlu1 %v502_v7, %s1582_s7  ;;  %606 = vrot.lane.b32.xlu0 %v493_v8, %s1583_s8  ;;  %v354_v0 = vsel %vm352_vm5, %v351_v57, %v1831_v19 }
  0x9a   : > { %v1836_v22 = vpop.permute.xlu1 %291  ;;  %v290_v23 = vpop.permute.xlu0 %289 }
  0x9b   : > { %v356_v49 = vsel %vm355_vm6, %v353_v45, %v290_v23  ;;  %v357_v2 = vsel %vm355_vm6, %v354_v0, %v1836_v22  ;;  %v647_v22 = vsel %vm263_vm2, %v644_v56, %v646_v13 }
  0x9c   : > { %571 = vrot.lane.b32.xlu1 %v568_v21, %s1588_s26  ;;  %561 = vrot.lane.b32.xlu0 %v1824_v16, %s1587_s21 }
  0x9e   : > { %v304_v30 = vpop.permute.xlu1 %303  ;;  %v302_v31 = vpop.permute.xlu0 %301 }
  0x9f   : > { %v359_v52 = vsel %vm358_vm7, %v356_v49, %v302_v31  ;;  %v360_v7 = vsel %vm358_vm7, %v357_v2, %v304_v30  ;;  %v658_v30 = vsel %vm275_vm1, %v655_v12, %v657_v25 }
  0xa0   : > { %616 = vrot.lane.b32.xlu1 %v1821_v11, %s1584_s9  ;;  %612 = vrot.lane.b32.xlu0 %v504_v10, %s1582_s7  ;;  %v654_v10 = vrot.slane %v1869_v46, 2 }
  0xa2   : > { %v1849_v34 = vpop.permute.xlu1 %373  ;;  %v313_v35 = vpop.permute.xlu0 %312 }
  0xa3   : > { %v362_v53 = vsel %vm361_vm8, %v359_v52, %v313_v35  ;;  %v434_v36 = vsel %vm349_vm4, %v1679_v15, %v1849_v34 }
  0xa4   : > { %582 = vrot.lane.b32.xlu1 %v579_v32, %s1589_s30  ;;  %573 = vrot.lane.b32.xlu0 %v570_v33, %s1588_s26 }
  0xa6   : > { %v321_v37 = vpop.permute.xlu1 %320  ;;  %v315_v38 = vpop.permute.xlu0 %314 }
  0xa7   : > { %v365_v54 = vsel %vm364_vm9, %v362_v53, %v321_v37  ;;  %v363_v8 = vsel %vm361_vm8, %v360_v7, %v315_v38  ;;  %v1938_v38 = vld [vmem:[%s1656_s6 + $0xa8] sm:$0xff] }
  0xa8   : > { %622 = vrot.lane.b32.xlu1 %v568_v21, %s1585_s10  ;;  %618 = vrot.lane.b32.xlu0 %v1824_v16, %s1584_s9  ;;  %v720_v45 = vrot.slane %v1938_v38, 1 }
  0xaa   : > { %v1857_v40 = vpop.permute.xlu1 %379  ;;  %v1859_v41 = vpop.permute.xlu0 %375 }
  0xab   : > { %v436_v37 = vsel %vm352_vm5, %v434_v36, %v1857_v40  ;;  %v435_v55 = vsel %vm349_vm4, %v1676_v14, %v1859_v41  ;;  %v1396_v36 = vld [vmem:[%s1656_s6 + $0xc8] sm:$0xff] }
  0xac   : > { %624 = vrot.lane.b32.xlu1 %v570_v33, %s1585_s10  ;;  %584 = vrot.lane.b32.xlu0 %v581_v39, %s1589_s30 }
  0xae   : > { %v333_v43 = vpop.permute.xlu1 %332  ;;  %v323_v44 = vpop.permute.xlu0 %322 }
  0xaf   : > { %v368_v58 = vsel %vm367_vm10, %v365_v54, %v333_v43  ;;  %v366_v9 = vsel %vm364_vm9, %v363_v8, %v323_v44  ;;  %v1947_v44 = vld [vmem:[%s1656_s6 + $0xb0] sm:$0xff] }
  0xb0   : > { %681 = vrot.lane.b32.xlu1 %v568_v21, %s1583_s8  ;;  %628 = vrot.lane.b32.xlu0 %v579_v32, %s1586_s11  ;;  %v656_v21 = vsel %vm275_vm1, %v654_v10, %v655_v12  ;;  %v721_v49 = vrot.slane %v1947_v44, 1 }
  0xb2   : > { %v1872_v50 = vpop.permute.xlu1 %385  ;;  %v1874_v1 = vpop.permute.xlu0 %381  ;;  %v722_v57 = vsel %vm263_vm2, %v720_v45, %v721_v49 }
  0xb3   : > { %v437_v56 = vsel %vm352_vm5, %v435_v55, %v1874_v1  ;;  %v731_v1 = vrot.slane %v1938_v38, 2  ;;  %v1397_v55 = vld [vmem:[%s1656_s6 + $0xd0] sm:$0x3] }
  0xb4   : > { %636 = vrot.lane.b32.xlu1 %v1869_v46, %s1587_s21  ;;  %630 = vrot.lane.b32.xlu0 %v581_v39, %s1586_s11 }
  0xb6   : > { %v344_v59 = vpop.permute.xlu1 %343  ;;  %v335_v62 = vpop.permute.xlu0 %334 }
  0xb7   : > { %v371_v63 = vsel %vm370_vm11, %v368_v58, %v344_v59  ;;  %v369_v17 = vsel %vm367_vm10, %v366_v9, %v335_v62 }
  0xb8   : > { %687 = vrot.lane.b32.xlu1 %v579_v32, %s1582_s7  ;;  %683 = vrot.lane.b32.xlu0 %v570_v33, %s1583_s8 }
  0xb9   : > { %1453 = vmatprep.mubr.msk.f32.mxu0 %vm917_vm12, %v371_v63  ;;  %v1392_v63 = vld [vmem:[%s1656_s6 + $0xb8] sm:$0x3] }
  0xba   : > { %v392_v4 = vpop.permute.xlu1 %391  ;;  %v388_v5 = vpop.permute.xlu0 %387  ;;  %v723_v2 = vrot.slane %v1392_v63, 1  ;;  %v734_v13 = vrot.slane %v1392_v63, 2 }
  0xbb   : > { %v439_v58 = vsel %vm355_vm6, %v437_v56, %v388_v5 }
  0xbc   : > { %648 = vrot.lane.b32.xlu1 %v645_v3, %s1588_s26  ;;  %638 = vrot.lane.b32.xlu0 %v1877_v51, %s1587_s21  ;;  %v724_v9 = vsel %vm263_vm2, %v721_v49, %v723_v2  ;;  %v811_v2 = vrot.slane %v1397_v55, 2 }
  0xbe   : > { %v394_v18 = vpop.permute.xlu1 %393  ;;  %v346_v19 = vpop.permute.xlu0 %345 }
  0xbf   : > { %v372_v20 = vsel %vm370_vm11, %v369_v17, %v346_v19  ;;  %v441_v0 = vsel %vm358_vm7, %v439_v58, %v394_v18  ;;  %v800_v58 = vrot.slane %v1397_v55, 1 }
  0xc0   : > { %693 = vrot.lane.b32.xlu1 %v1869_v46, %s1584_s9  ;;  %689 = vrot.lane.b32.xlu0 %v581_v39, %s1582_s7  ;;  %v438_v39 = vsel %vm355_vm6, %v436_v37, %v1872_v50 }
  0xc1   : > { %1454 = vmatmul.mubr.msk.f32.vlgmr.msra.gmra.mrb[0].mxu0 %vm917_vm12, %v372_v20  ;;  %v440_v15 = vsel %vm358_vm7, %v438_v39, %v392_v4  ;;  %v798_v39 = vrot.slane %v1396_v36, 1 }
  0xc2   : > { %v1916_v23 = vpop.permute.xlu1 %450  ;;  %v398_v24 = vpop.permute.xlu0 %397 }
  0xc3   : > { %v442_v34 = vsel %vm361_vm8, %v440_v15, %v398_v24  ;;  %v511_v25 = vsel %vm349_vm4, %v1700_v26, %v1916_v23 }
  0xc4   : > { %659 = vrot.lane.b32.xlu1 %v656_v21, %s1589_s30  ;;  %650 = vrot.lane.b32.xlu0 %v647_v22, %s1588_s26 }
  0xc6   : > { %v406_v27 = vpop.permute.xlu1 %405  ;;  %v400_v29 = vpop.permute.xlu0 %399 }
  0xc7   : > { %v444_v40 = vsel %vm364_vm9, %v442_v34, %v406_v27  ;;  %v443_v14 = vsel %vm361_vm8, %v441_v0, %v400_v29  ;;  %v1395_v29 = vld [vmem:[%s1656_s6 + $0xc0] sm:$0xff] }
  0xc8   : > { %699 = vrot.lane.b32.xlu1 %v645_v3, %s1585_s10  ;;  %695 = vrot.lane.b32.xlu0 %v1877_v51, %s1584_s9 }
  0xca   : > { %v1924_v31 = vpop.permute.xlu1 %456  ;;  %v1926_v32 = vpop.permute.xlu0 %452 }
  0xcb   : > { %v513_v27 = vsel %vm352_vm5, %v511_v25, %v1924_v31  ;;  %v797_v31 = vrot.slane %v1395_v29, 1  ;;  %v512_v45 = vsel %vm349_vm4, %v1704_v28, %v1926_v32 }
  0xcc   : > { %701 = vrot.lane.b32.xlu1 %v647_v22, %s1585_s10  ;;  %661 = vrot.lane.b32.xlu0 %v658_v30, %s1589_s30 }
  0xce   : > { %v418_v33 = vpop.permute.xlu1 %417  ;;  %v408_v35 = vpop.permute.xlu0 %407 }
  0xcf   : > { %v446_v50 = vsel %vm367_vm10, %v444_v40, %v418_v33  ;;  %v445_v41 = vsel %vm364_vm9, %v443_v14, %v408_v35 }
  0xd0   : > { %758 = vrot.lane.b32.xlu1 %v645_v3, %s1583_s8  ;;  %705 = vrot.lane.b32.xlu0 %v656_v21, %s1586_s11  ;;  %v732_v3 = vrot.slane %v1947_v44, 2 }
  0xd2   : > { %v1942_v42 = vpop.permute.xlu1 %462  ;;  %v1944_v43 = vpop.permute.xlu0 %458  ;;  %v733_v8 = vsel %vm275_vm1, %v731_v1, %v732_v3  ;;  %v735_v19 = vsel %vm275_vm1, %v732_v3, %v734_v13  ;;  %v1401_v13 = vld [vmem:[%s1656_s6 + $0xe0] sm:$0xff] }
  0xd3   : > { %v514_v49 = vsel %vm352_vm5, %v512_v45, %v1944_v43  ;;  %v808_v43 = vrot.slane %v1395_v29, 2 }
  0xd4   : > { %713 = vrot.lane.b32.xlu1 %v1938_v38, %s1587_s21  ;;  %707 = vrot.lane.b32.xlu0 %v658_v30, %s1586_s11 }
  0xd6   : > { %v429_v52 = vpop.permute.xlu1 %428  ;;  %v420_v53 = vpop.permute.xlu0 %419 }
  0xd7   : > { %v448_v54 = vsel %vm370_vm11, %v446_v50, %v429_v52  ;;  %v447_v4 = vsel %vm367_vm10, %v445_v41, %v420_v53  ;;  %v799_v50 = vsel %vm263_vm2, %v797_v31, %v798_v39  ;;  %v801_v41 = vsel %vm263_vm2, %v798_v39, %v800_v58 }
  0xd8   : > { %764 = vrot.lane.b32.xlu1 %v656_v21, %s1582_s7  ;;  %760 = vrot.lane.b32.xlu0 %v647_v22, %s1583_s8 }
  0xd9   : > { %1456 = vmatprep.mubr.msk.f32.mxu0 %vm917_vm12, %v448_v54 }
  0xda   : > { %v469_v59 = vpop.permute.xlu1 %468  ;;  %v465_v62 = vpop.permute.xlu0 %464 }
  0xdb   : > { %v516_v52 = vsel %vm355_vm6, %v514_v49, %v465_v62 }
  0xdc   : > { %725 = vrot.lane.b32.xlu1 %v722_v57, %s1588_s26  ;;  %715 = vrot.lane.b32.xlu0 %v1947_v44, %s1587_s21 }
  0xde   : > { %v471_v5 = vpop.permute.xlu1 %470  ;;  %v431_v6 = vpop.permute.xlu0 %430 }
  0xdf   : > { %v449_v7 = vsel %vm370_vm11, %v447_v4, %v431_v6  ;;  %v518_v56 = vsel %vm358_vm7, %v516_v52, %v471_v5 }
  0xe0   : > { %770 = vrot.lane.b32.xlu1 %v1938_v38, %s1584_s9  ;;  %766 = vrot.lane.b32.xlu0 %v658_v30, %s1582_s7  ;;  %v515_v30 = vsel %vm355_vm6, %v513_v27, %v1942_v42 }
  0xe1   : > { %1457 = vmatmul.mubr.msk.f32.gmra.mrb[2].mxu0 %vm917_vm12, %v449_v7  ;;  %v517_v37 = vsel %vm358_vm7, %v515_v30, %v469_v59 }
  0xe2   : > { %v1986_v10 = vpop.permute.xlu1 %527  ;;  %v475_v12 = vpop.permute.xlu0 %474 }
  0xe3   : > { %v519_v26 = vsel %vm361_vm8, %v517_v37, %v475_v12 }
  0xe4   : > { %736 = vrot.lane.b32.xlu1 %v733_v8, %s1589_s30  ;;  %727 = vrot.lane.b32.xlu0 %v724_v9, %s1588_s26 }
  0xe6   : > { %v483_v17 = vpop.permute.xlu1 %482  ;;  %v477_v18 = vpop.permute.xlu0 %476 }
  0xe7   : > { %v521_v23 = vsel %vm364_vm9, %v519_v26, %v483_v17  ;;  %v520_v28 = vsel %vm361_vm8, %v518_v56, %v477_v18  ;;  %v1400_v17 = vld [vmem:[%s1656_s6 + $0xd8] sm:$0xff]  ;;  %v1402_v18 = vld [vmem:[%s1656_s6 + $0xe8] sm:$0x3] }
  0xe8   : > { %776 = vrot.lane.b32.xlu1 %v722_v57, %s1585_s10  ;;  %772 = vrot.lane.b32.xlu0 %v1947_v44, %s1584_s9  ;;  %v874_v25 = vrot.slane %v1400_v17, 1  ;;  %v877_v27 = vrot.slane %v1402_v18, 1  ;;  %v888_v39 = vrot.slane %v1402_v18, 2 }
  0xea   : > { %v1994_v20 = vpop.permute.xlu1 %533  ;;  %v1996_v21 = vpop.permute.xlu0 %529 }
  0xec   : > { %778 = vrot.lane.b32.xlu1 %v724_v9, %s1585_s10  ;;  %738 = vrot.lane.b32.xlu0 %v735_v19, %s1589_s30 }
  0xee   : > { %v495_v22 = vpop.permute.xlu1 %494  ;;  %v485_v24 = vpop.permute.xlu0 %484 }
  0xef   : > { %v523_v42 = vsel %vm367_vm10, %v521_v23, %v495_v22  ;;  %v522_v32 = vsel %vm364_vm9, %v520_v28, %v485_v24  ;;  %v875_v24 = vrot.slane %v1401_v13, 1 }
  0xf0   : > { %835 = vrot.lane.b32.xlu1 %v722_v57, %s1583_s8  ;;  %782 = vrot.lane.b32.xlu0 %v733_v8, %s1586_s11  ;;  %v809_v57 = vrot.slane %v1396_v36, 2 }
  0xf1   : > { %v878_v23 = vsel %vm263_vm2, %v875_v24, %v877_v27  ;;  %v876_v31 = vsel %vm263_vm2, %v874_v25, %v875_v24 }
  0xf2   : > { %v2010_v33 = vpop.permute.xlu1 %539  ;;  %v2012_v35 = vpop.permute.xlu0 %535  ;;  %v810_v14 = vsel %vm275_vm1, %v808_v43, %v809_v57  ;;  %v812_v6 = vsel %vm275_vm1, %v809_v57, %v811_v2 }
  0xf4   : > { %790 = vrot.lane.b32.xlu1 %v1395_v29, %s1587_s21  ;;  %784 = vrot.lane.b32.xlu0 %v735_v19, %s1586_s11 }
  0xf6   : > { %v506_v15 = vpop.permute.xlu1 %505  ;;  %v497_v34 = vpop.permute.xlu0 %496 }
  0xf7   : > { %v525_v40 = vsel %vm370_vm11, %v523_v42, %v506_v15  ;;  %v524_v59 = vsel %vm367_vm10, %v522_v32, %v497_v34 }
  0xf8   : > { %841 = vrot.lane.b32.xlu1 %v733_v8, %s1582_s7  ;;  %837 = vrot.lane.b32.xlu0 %v724_v9, %s1583_s8 }
  0xf9   : > { %1459 = vmatprep.mubr.msk.f32.mxu0 %vm917_vm12, %v525_v40  ;;  %v589_v40 = vsel %vm349_vm4, %v1754_v48, %v1996_v21 }
  0xfa   : > { %v546_v53 = vpop.permute.xlu1 %545  ;;  %v2032_v54 = vpop.permute.xlu0 %541  ;;  %v591_v45 = vsel %vm352_vm5, %v589_v40, %v2012_v35 }
  0xfb   : > { %v593_v52 = vsel %vm355_vm6, %v591_v45, %v2032_v54 }
  0xfc   : > { %802 = vrot.lane.b32.xlu1 %v799_v50, %s1588_s26  ;;  %792 = vrot.lane.b32.xlu0 %v1396_v36, %s1587_s21 }
  0xfe   : > { %v548_v62 = vpop.permute.xlu1 %547  ;;  %v508_v63 = vpop.permute.xlu0 %507 }
  0xff   : > { %v526_v0 = vsel %vm370_vm11, %v524_v59, %v508_v63  ;;  %v595_v48 = vsel %vm358_vm7, %v593_v52, %v548_v62 }
 0x100   : > { %847 = vrot.lane.b32.xlu1 %v1395_v29, %s1584_s9  ;;  %843 = vrot.lane.b32.xlu0 %v735_v19, %s1582_s7  ;;  %v588_v19 = vsel %vm349_vm4, %v1751_v47, %v1986_v10  ;;  %v886_v47 = vrot.slane %v1401_v13, 2  ;;  %v885_v10 = vrot.slane %v1400_v17, 2 }
 0x101   : > { %1460 = vmatmul.mubr.msk.f32.gmra.mrb[4].mxu0 %vm917_vm12, %v526_v0  ;;  %v590_v22 = vsel %vm352_vm5, %v588_v19, %v1994_v20 }
 0x102   : > { %v2047_v1 = vpop.permute.xlu1 %604  ;;  %v552_v3 = vpop.permute.xlu0 %551  ;;  %v592_v29 = vsel %vm355_vm6, %v590_v22, %v2010_v33  ;;  %v889_v49 = vsel %vm275_vm1, %v886_v47, %v888_v39 }
 0x103   : > { %v594_v37 = vsel %vm358_vm7, %v592_v29, %v546_v53 }
 0x104   : > { %813 = vrot.lane.b32.xlu1 %v810_v14, %s1589_s30  ;;  %804 = vrot.lane.b32.xlu0 %v801_v41, %s1588_s26  ;;  %v596_v26 = vsel %vm361_vm8, %v594_v37, %v552_v3 }
 0x106   : > { %v560_v4 = vpop.permute.xlu1 %559  ;;  %v554_v5 = vpop.permute.xlu0 %553 }
 0x107   : > { %v598_v20 = vsel %vm364_vm9, %v596_v26, %v560_v4  ;;  %v597_v21 = vsel %vm361_vm8, %v595_v48, %v554_v5 }
 0x108   : > { %853 = vrot.lane.b32.xlu1 %v799_v50, %s1585_s10  ;;  %849 = vrot.lane.b32.xlu0 %v1396_v36, %s1584_s9  ;;  %v887_v50 = vsel %vm275_vm1, %v885_v10, %v886_v47 }
 0x10a   : > { %v2054_v7 = vpop.permute.xlu1 %610  ;;  %v2056_v8 = vpop.permute.xlu0 %606 }
 0x10c   : > { %855 = vrot.lane.b32.xlu1 %v801_v41, %s1585_s10  ;;  %815 = vrot.lane.b32.xlu0 %v812_v6, %s1589_s30  ;;  %v665_v41 = vsel %vm349_vm4, %v1786_v60, %v2047_v1  ;;  %v666_v60 = vsel %vm349_vm4, %v1789_v61, %v2056_v8 }
 0x10d   : > { %v667_v3 = vsel %vm352_vm5, %v665_v41, %v2054_v7 }
 0x10e   : > { %v572_v9 = vpop.permute.xlu1 %571  ;;  %v562_v12 = vpop.permute.xlu0 %561 }
 0x10f   : > { %v600_v33 = vsel %vm367_vm10, %v598_v20, %v572_v9  ;;  %v599_v35 = vsel %vm364_vm9, %v597_v21, %v562_v12 }
 0x110   : > { %861 = vrot.lane.b32.xlu1 %v812_v6, %s1586_s11  ;;  %859 = vrot.lane.b32.xlu0 %v810_v14, %s1586_s11 }
 0x112   : > { %v617_v30 = vpop.permute.xlu1 %616  ;;  %v613_v36 = vpop.permute.xlu0 %612 }
 0x113   : > { %v669_v2 = vsel %vm355_vm6, %v667_v3, %v617_v30  ;;  %v668_v1 = vsel %vm352_vm5, %v666_v60, %v613_v36 }
 0x114   : > { %869 = vrot.lane.b32.xlu1 %v1401_v13, %s1587_s21  ;;  %867 = vrot.lane.b32.xlu0 %v1400_v17, %s1587_s21 }
 0x116   : > { %v583_v42 = vpop.permute.xlu1 %582  ;;  %v574_v15 = vpop.permute.xlu0 %573 }
 0x117   : > { %v602_v34 = vsel %vm370_vm11, %v600_v33, %v583_v42  ;;  %v601_v56 = vsel %vm367_vm10, %v599_v35, %v574_v15 }
 0x118   : > { %881 = vrot.lane.b32.xlu1 %v878_v23, %s1588_s26  ;;  %879 = vrot.lane.b32.xlu0 %v876_v31, %s1588_s26 }
 0x119   : > { %1462 = vmatprep.mubr.msk.f32.mxu0 %vm917_vm12, %v602_v34 }
 0x11a   : > { %v623_v53 = vpop.permute.xlu1 %622  ;;  %v619_v55 = vpop.permute.xlu0 %618 }
 0x11b   : > { %v671_v6 = vsel %vm358_vm7, %v669_v2, %v623_v53  ;;  %v670_v7 = vsel %vm355_vm6, %v668_v1, %v619_v55 }
 0x11c   : > { %892 = vrot.lane.b32.xlu1 %v889_v49, %s1589_s30  ;;  %890 = vrot.lane.b32.xlu0 %v887_v50, %s1589_s30 }
 0x11e   : > { %v625_v28 = vpop.permute.xlu1 %624  ;;  %v585_v32 = vpop.permute.xlu0 %584 }
 0x11f   : > { %v603_v43 = vsel %vm370_vm11, %v601_v56, %v585_v32  ;;  %v672_v25 = vsel %vm358_vm7, %v670_v7, %v625_v28 }
 0x120   : > { %1463 = vmatmul.mubr.msk.f32.gmra.mrb[6].mxu0 %vm917_vm12, %v603_v43 }
 0x122   : > { %v682_v54 = vpop.permute.xlu1 %681  ;;  %v629_v57 = vpop.permute.xlu0 %628 }
 0x123   : > { %v673_v9 = vsel %vm361_vm8, %v671_v6, %v629_v57  ;;  %v742_v33 = vsel %vm349_vm4, %v1821_v11, %v682_v54 }
 0x126   : > { %v637_v58 = vpop.permute.xlu1 %636  ;;  %v631_v59 = vpop.permute.xlu0 %630 }
 0x127   : > { %v675_v12 = vsel %vm364_vm9, %v673_v9, %v637_v58  ;;  %v674_v27 = vsel %vm361_vm8, %v672_v25, %v631_v59 }
 0x12a   : > { %v688_v62 = vpop.permute.xlu1 %687  ;;  %v684_v63 = vpop.permute.xlu0 %683 }
 0x12b   : > { %v744_v42 = vsel %vm352_vm5, %v742_v33, %v688_v62  ;;  %v743_v11 = vsel %vm349_vm4, %v1824_v16, %v684_v63 }
 0x12e   : > { %v649_v0 = vpop.permute.xlu1 %648  ;;  %v639_v14 = vpop.permute.xlu0 %638 }
 0x12f   : > { %v677_v13 = vsel %vm367_vm10, %v675_v12, %v649_v0  ;;  %v676_v29 = vsel %vm364_vm9, %v674_v27, %v639_v14 }
 0x132   : > { %v694_v4 = vpop.permute.xlu1 %693  ;;  %v690_v5 = vpop.permute.xlu0 %689 }
 0x133   : > { %v746_v15 = vsel %vm355_vm6, %v744_v42, %v694_v4  ;;  %v745_v21 = vsel %vm352_vm5, %v743_v11, %v690_v5 }
 0x136   : > { %v660_v17 = vpop.permute.xlu1 %659  ;;  %v651_v18 = vpop.permute.xlu0 %650 }
 0x137   : > { %v679_v19 = vsel %vm370_vm11, %v677_v13, %v660_v17  ;;  %v678_v30 = vsel %vm367_vm10, %v676_v29, %v651_v18 }
 0x138   : > { %1465 = vmatprep.mubr.msk.f32.mxu1 %vm917_vm12, %v679_v19 }
 0x13a   : > { %v700_v22 = vpop.permute.xlu1 %699  ;;  %v696_v24 = vpop.permute.xlu0 %695 }
 0x13b   : > { %v748_v45 = vsel %vm358_vm7, %v746_v15, %v700_v22  ;;  %v747_v35 = vsel %vm355_vm6, %v745_v21, %v696_v24 }
 0x13e   : > { %v702_v37 = vpop.permute.xlu1 %701  ;;  %v662_v26 = vpop.permute.xlu0 %661 }
 0x13f   : > { %v680_v61 = vsel %vm370_vm11, %v678_v30, %v662_v26  ;;  %v749_v32 = vsel %vm358_vm7, %v747_v35, %v702_v37 }
 0x140   : > { %1466 = vmatmul.mubr.msk.f32.vlgmr.msra.gmra.mrb[0].mxu1 %vm917_vm12, %v680_v61 }
 0x142   : > { %v759_v8 = vpop.permute.xlu1 %758  ;;  %v706_v36 = vpop.permute.xlu0 %705 }
 0x143   : > { %v750_v49 = vsel %vm361_vm8, %v748_v45, %v706_v36  ;;  %v819_v5 = vsel %vm349_vm4, %v1869_v46, %v759_v8 }
 0x146   : > { %v714_v47 = vpop.permute.xlu1 %713  ;;  %v708_v10 = vpop.permute.xlu0 %707 }
 0x147   : > { %v752_v50 = vsel %vm364_vm9, %v750_v49, %v714_v47  ;;  %v751_v43 = vsel %vm361_vm8, %v749_v32, %v708_v10 }
 0x14a   : > { %v765_v20 = vpop.permute.xlu1 %764  ;;  %v761_v23 = vpop.permute.xlu0 %760 }
 0x14b   : > { %v821_v6 = vsel %vm352_vm5, %v819_v5, %v765_v20  ;;  %v820_v46 = vsel %vm349_vm4, %v1877_v51, %v761_v23 }
 0x14e   : > { %v726_v31 = vpop.permute.xlu1 %725  ;;  %v716_v39 = vpop.permute.xlu0 %715 }
 0x14f   : > { %v754_v52 = vsel %vm367_vm10, %v752_v50, %v726_v31  ;;  %v753_v54 = vsel %vm364_vm9, %v751_v43, %v716_v39 }
 0x152   : > { %v771_v34 = vpop.permute.xlu1 %770  ;;  %v767_v40 = vpop.permute.xlu0 %766 }
 0x153   : > { %v823_v9 = vsel %vm355_vm6, %v821_v6, %v771_v34  ;;  %v822_v24 = vsel %vm352_vm5, %v820_v46, %v767_v40 }
 0x156   : > { %v737_v53 = vpop.permute.xlu1 %736  ;;  %v728_v55 = vpop.permute.xlu0 %727 }
 0x157   : > { %v756_v48 = vsel %vm370_vm11, %v754_v52, %v737_v53  ;;  %v755_v57 = vsel %vm367_vm10, %v753_v54, %v728_v55 }
 0x158   : > { %1468 = vmatprep.mubr.msk.f32.mxu1 %vm917_vm12, %v756_v48 }
 0x15a   : > { %v777_v56 = vpop.permute.xlu1 %776  ;;  %v773_v28 = vpop.permute.xlu0 %772 }
 0x15b   : > { %v825_v17 = vsel %vm358_vm7, %v823_v9, %v777_v56  ;;  %v824_v25 = vsel %vm355_vm6, %v822_v24, %v773_v28 }
 0x15e   : > { %v779_v58 = vpop.permute.xlu1 %778  ;;  %v739_v59 = vpop.permute.xlu0 %738 }
 0x15f   : > { %v757_v16 = vsel %vm370_vm11, %v755_v57, %v739_v59  ;;  %v826_v30 = vsel %vm358_vm7, %v824_v25, %v779_v58 }
 0x160   : > { %1469 = vmatmul.mubr.msk.f32.gmra.mrb[2].mxu1 %vm917_vm12, %v757_v16 }
 0x162   : > { %v836_v62 = vpop.permute.xlu1 %835  ;;  %v783_v63 = vpop.permute.xlu0 %782 }
 0x163   : > { %v827_v18 = vsel %vm361_vm8, %v825_v17, %v783_v63  ;;  %v896_v31 = vsel %vm349_vm4, %v1938_v38, %v836_v62 }
 0x166   : > { %v791_v0 = vpop.permute.xlu1 %790  ;;  %v785_v14 = vpop.permute.xlu0 %784 }
 0x167   : > { %v829_v19 = vsel %vm364_vm9, %v827_v18, %v791_v0  ;;  %v828_v37 = vsel %vm361_vm8, %v826_v30, %v785_v14 }
 0x16a   : > { %v842_v41 = vpop.permute.xlu1 %841  ;;  %v838_v3 = vpop.permute.xlu0 %837 }
 0x16b   : > { %v897_v39 = vsel %vm349_vm4, %v1947_v44, %v838_v3  ;;  %v898_v33 = vsel %vm352_vm5, %v896_v31, %v842_v41 }
 0x16e   : > { %v803_v2 = vpop.permute.xlu1 %802  ;;  %v793_v4 = vpop.permute.xlu0 %792 }
 0x16f   : > { %v831_v60 = vsel %vm367_vm10, %v829_v19, %v803_v2  ;;  %v830_v26 = vsel %vm364_vm9, %v828_v37, %v793_v4 }
 0x172   : > { %v848_v12 = vpop.permute.xlu1 %847  ;;  %v844_v13 = vpop.permute.xlu0 %843 }
 0x173   : > { %v899_v42 = vsel %vm352_vm5, %v897_v39, %v844_v13  ;;  %v900_v15 = vsel %vm355_vm6, %v898_v33, %v848_v12 }
 0x176   : > { %v814_v1 = vpop.permute.xlu1 %813  ;;  %v805_v7 = vpop.permute.xlu0 %804 }
 0x177   : > { %v833_v22 = vsel %vm370_vm11, %v831_v60, %v814_v1  ;;  %v832_v61 = vsel %vm367_vm10, %v830_v26, %v805_v7 }
 0x178   : > { %1471 = vmatprep.mubr.msk.f32.mxu1 %vm917_vm12, %v833_v22 }
 0x17a   : > { %v854_v27 = vpop.permute.xlu1 %853  ;;  %v850_v29 = vpop.permute.xlu0 %849 }
 0x17b   : > { %v901_v34 = vsel %vm355_vm6, %v899_v42, %v850_v29  ;;  %v902_v49 = vsel %vm358_vm7, %v900_v15, %v854_v27 }
 0x17e   : > { %v856_v8 = vpop.permute.xlu1 %855  ;;  %v816_v36 = vpop.permute.xlu0 %815 }
 0x17f   : > { %v834_v51 = vsel %vm370_vm11, %v832_v61, %v816_v36  ;;  %v903_v50 = vsel %vm358_vm7, %v901_v34, %v856_v8 }
 0x180   : > { %1472 = vmatmul.mubr.msk.f32.gmra.mrb[4].mxu1 %vm917_vm12, %v834_v51 }
 0x182   : > { %v862_v47 = vpop.permute.xlu1 %861  ;;  %v860_v10 = vpop.permute.xlu0 %859 }
 0x183   : > { %v905_v38 = vsel %vm361_vm8, %v903_v50, %v862_v47  ;;  %v904_v52 = vsel %vm361_vm8, %v902_v49, %v860_v10 }
 0x186   : > { %v870_v20 = vpop.permute.xlu1 %869  ;;  %v868_v23 = vpop.permute.xlu0 %867 }
 0x187   : > { %v907_v44 = vsel %vm364_vm9, %v905_v38, %v870_v20  ;;  %v906_v53 = vsel %vm364_vm9, %v904_v52, %v868_v23 }
 0x18a   : > { %v882_v40 = vpop.permute.xlu1 %881  ;;  %v880_v45 = vpop.permute.xlu0 %879 }
 0x18b   : > { %v909_v55 = vsel %vm367_vm10, %v907_v44, %v882_v40  ;;  %v908_v48 = vsel %vm367_vm10, %v906_v53, %v880_v45 }
 0x18e   : > { %v893_v11 = vpop.permute.xlu1 %892  ;;  %v891_v21 = vpop.permute.xlu0 %890 }
 0x18f   : > { %v911_v35 = vsel %vm370_vm11, %v909_v55, %v893_v11  ;;  %v910_v56 = vsel %vm370_vm11, %v908_v48, %v891_v21 }
 0x190   : > { %1474 = vmatprep.mubr.msk.f32.mxu1 %vm917_vm12, %v910_v56 }
 0x191   : > { %1475 = vmatmul.mubr.msk.f32.gmra.mrb[6].mxu1 %vm917_vm12, %v911_v35 }
 0x194   : > { %v1455_v28 = vpop.f32.mrb[0].mxu0 }
 0x195   : > { %1116 = vst.msk [vmem:[%s1650_s29 + $0x8] sm:$0xff] %vm352_vm5, %v1455_v28  ;;  %v1132_v32 = vsel %vm352_vm5, %v1455_v28, 0.0  ;;  %v1169_v43 = vmul.f32 %v1455_v28, %v1455_v28  ;;  %v1036_v54 = vpop.f32.mrb[1].mxu0 }
 0x196   : > { %1115 = vst.msk [vmem:[%s1650_s29] sm:$0xff] %vm352_vm5, %v1036_v54  ;;  %v1131_v57 = vsel %vm352_vm5, %v1036_v54, 0.0  ;;  %v1168_v58 = vmul.f32 %v1036_v54, %v1036_v54 }
 0x197   : > { %v1185_v59 = vsel %vm352_vm5, %v1169_v43, 0.0  ;;  %v1133_v16 = vadd.f32 %v1132_v32, %v1131_v57 }
 0x198   : > { %v1184_v62 = vsel %vm352_vm5, %v1168_v58, 0.0 }
 0x199   : > { %v1186_v63 = vadd.f32 %v1185_v59, %v1184_v62 }
 0x1b4   : > { %v1458_v0 = vpop.f32.mrb[2].mxu0 }
 0x1b5   : > { %1118 = vst.msk [vmem:[%s1650_s29 + $0x18] sm:$0xff] %vm352_vm5, %v1458_v0  ;;  %v1046_v14 = vpop.f32.mrb[3].mxu0  ;;  %v1171_v41 = vmul.f32 %v1458_v0, %v1458_v0  ;;  %v1136_v5 = vsel %vm352_vm5, %v1458_v0, 0.0 }
 0x1b6   : > { %1117 = vst.msk [vmem:[%s1650_s29 + $0x10] sm:$0xff] %vm352_vm5, %v1046_v14  ;;  %v1134_v3 = vsel %vm352_vm5, %v1046_v14, 0.0  ;;  %v1170_v2 = vmul.f32 %v1046_v14, %v1046_v14 }
 0x1b7   : > { %v1135_v4 = vadd.f32 %v1134_v3, %v1133_v16  ;;  %v1189_v13 = vsel %vm352_vm5, %v1171_v41, 0.0 }
 0x1b8   : > { %v1187_v6 = vsel %vm352_vm5, %v1170_v2, 0.0 }
 0x1b9   : > { %v1188_v9 = vadd.f32 %v1187_v6, %v1186_v63  ;;  %v1137_v12 = vadd.f32 %v1136_v5, %v1135_v4 }
 0x1bb   : > { %v1190_v17 = vadd.f32 %v1189_v13, %v1188_v9 }
 0x1d4   : > { %v1461_v18 = vpop.f32.mrb[4].mxu0 }
 0x1d5   : > { %1120 = vst.msk [vmem:[%s1650_s29 + $0x28] sm:$0xff] %vm352_vm5, %v1461_v18  ;;  %v1056_v19 = vpop.f32.mrb[5].mxu0  ;;  %v1173_v60 = vmul.f32 %v1461_v18, %v1461_v18  ;;  %v1140_v46 = vsel %vm352_vm5, %v1461_v18, 0.0 }
 0x1d6   : > { %1119 = vst.msk [vmem:[%s1650_s29 + $0x20] sm:$0xff] %vm352_vm5, %v1056_v19  ;;  %v1138_v1 = vsel %vm352_vm5, %v1056_v19, 0.0  ;;  %v1172_v7 = vmul.f32 %v1056_v19, %v1056_v19 }
 0x1d7   : > { %v1139_v22 = vadd.f32 %v1138_v1, %v1137_v12  ;;  %v1193_v29 = vsel %vm352_vm5, %v1173_v60, 0.0 }
 0x1d8   : > { %v1191_v24 = vsel %vm352_vm5, %v1172_v7, 0.0 }
 0x1d9   : > { %v1192_v25 = vadd.f32 %v1191_v24, %v1190_v17  ;;  %v1141_v27 = vadd.f32 %v1140_v46, %v1139_v22 }
 0x1db   : > { %v1194_v30 = vadd.f32 %v1193_v29, %v1192_v25 }
 0x1f3   : > { %v1464_v37 = vpop.f32.mrb[6].mxu0 }
 0x1f4   : > { %1122 = vst.msk [vmem:[%s1650_s29 + $0x38] sm:$0xff] %vm352_vm5, %v1464_v37  ;;  %v1066_v26 = vpop.f32.mrb[7].mxu0  ;;  %v1175_v61 = vmul.f32 %v1464_v37, %v1464_v37  ;;  %v1144_v47 = vsel %vm352_vm5, %v1464_v37, 0.0 }
 0x1f5   : > { %1121 = vst.msk [vmem:[%s1650_s29 + $0x30] sm:$0xff] %vm352_vm5, %v1066_v26  ;;  %v1142_v8 = vsel %vm352_vm5, %v1066_v26, 0.0  ;;  %v1174_v36 = vmul.f32 %v1066_v26, %v1066_v26 }
 0x1f6   : > { %v1143_v51 = vadd.f32 %v1142_v8, %v1141_v27  ;;  %v1197_v31 = vsel %vm352_vm5, %v1175_v61, 0.0 }
 0x1f7   : > { %v1195_v10 = vsel %vm352_vm5, %v1174_v36, 0.0 }
 0x1f8   : > { %v1145_v20 = vadd.f32 %v1144_v47, %v1143_v51  ;;  %v1196_v23 = vadd.f32 %v1195_v10, %v1194_v30 }
 0x1fa   : > { %v1198_v39 = vadd.f32 %v1197_v31, %v1196_v23 }
 0x213   : > { %v1467_v33 = vpop.f32.mrb[0].mxu1 }
 0x214   : > { %1124 = vst.msk [vmem:[%s1650_s29 + $0x48] sm:$0xff] %vm352_vm5, %v1467_v33  ;;  %v1076_v42 = vpop.f32.mrb[1].mxu1  ;;  %v1177_v15 = vmul.f32 %v1467_v33, %v1467_v33  ;;  %v1148_v49 = vsel %vm352_vm5, %v1467_v33, 0.0 }
 0x215   : > { %1123 = vst.msk [vmem:[%s1650_s29 + $0x40] sm:$0xff] %vm352_vm5, %v1076_v42  ;;  %v1146_v34 = vsel %vm352_vm5, %v1076_v42, 0.0  ;;  %v1176_v40 = vmul.f32 %v1076_v42, %v1076_v42 }
 0x216   : > { %v1147_v45 = vadd.f32 %v1146_v34, %v1145_v20  ;;  %v1201_v44 = vsel %vm352_vm5, %v1177_v15, 0.0  ;;  %v1221_v20 = vld [vmem:[%s2272_s3] sm:$0x3] }
 0x217   : > { %v1199_v50 = vsel %vm352_vm5, %v1176_v40, 0.0 }
 0x218   : > { %v1200_v38 = vadd.f32 %v1199_v50, %v1198_v39  ;;  %v1149_v52 = vadd.f32 %v1148_v49, %v1147_v45 }
 0x21a   : > { %v1202_v53 = vadd.f32 %v1201_v44, %v1200_v38 }
 0x233   : > { %v1470_v55 = vpop.f32.mrb[2].mxu1 }
 0x234   : > { %1126 = vst.msk [vmem:[%s1650_s29 + $0x58] sm:$0xff] %vm352_vm5, %v1470_v55  ;;  %v1086_v48 = vpop.f32.mrb[3].mxu1  ;;  %v1179_v11 = vmul.f32 %v1470_v55, %v1470_v55  ;;  %v1152_v28 = vsel %vm352_vm5, %v1470_v55, 0.0 }
 0x235   : > { %1125 = vst.msk [vmem:[%s1650_s29 + $0x50] sm:$0xff] %vm352_vm5, %v1086_v48  ;;  %v1150_v21 = vsel %vm352_vm5, %v1086_v48, 0.0  ;;  %v1178_v35 = vmul.f32 %v1086_v48, %v1086_v48 }
 0x236   : > { %v1151_v56 = vadd.f32 %v1150_v21, %v1149_v52  ;;  %v1205_v57 = vsel %vm352_vm5, %v1179_v11, 0.0 }
 0x237   : > { %v1203_v32 = vsel %vm352_vm5, %v1178_v35, 0.0 }
 0x238   : > { %v1204_v43 = vadd.f32 %v1203_v32, %v1202_v53  ;;  %v1153_v54 = vadd.f32 %v1152_v28, %v1151_v56 }
 0x23a   : > { %v1206_v58 = vadd.f32 %v1205_v57, %v1204_v43 }
 0x253   : > { %v1473_v59 = vpop.f32.mrb[4].mxu1 }
 0x254   : > { %1128 = vst.msk [vmem:[%s1650_s29 + $0x68] sm:$0xff] %vm352_vm5, %v1473_v59  ;;  %v1096_v16 = vpop.f32.mrb[5].mxu1  ;;  %v1181_v62 = vmul.f32 %v1473_v59, %v1473_v59  ;;  %v1156_v41 = vsel %vm352_vm5, %v1473_v59, 0.0 }
 0x255   : > { %1127 = vst.msk [vmem:[%s1650_s29 + $0x60] sm:$0xff] %vm352_vm5, %v1096_v16  ;;  %v1154_v63 = vsel %vm352_vm5, %v1096_v16, 0.0  ;;  %v1180_v0 = vmul.f32 %v1096_v16, %v1096_v16 }
 0x256   : > { %v1155_v14 = vadd.f32 %v1154_v63, %v1153_v54  ;;  %v1209_v5 = vsel %vm352_vm5, %v1181_v62, 0.0 }
 0x257   : > { %v1207_v3 = vsel %vm352_vm5, %v1180_v0, 0.0 }
 0x258   : > { %v1208_v2 = vadd.f32 %v1207_v3, %v1206_v58  ;;  %v1157_v4 = vadd.f32 %v1156_v41, %v1155_v14 }
 0x25a   : > { %v1210_v6 = vadd.f32 %v1209_v5, %v1208_v2 }
 0x264   : > { %v1476_v9 = vpop.f32.mrb[6].mxu1 }
 0x265   : > { %1130 = vst.msk [vmem:[%s1650_s29 + $0x78] sm:$0xff] %vm352_vm5, %v1476_v9  ;;  %v1106_v12 = vpop.f32.mrb[7].mxu1  ;;  %v1183_v13 = vmul.f32 %v1476_v9, %v1476_v9  ;;  %v1160_v60 = vsel %vm352_vm5, %v1476_v9, 0.0 }
 0x266   : > { %1129 = vst.msk [vmem:[%s1650_s29 + $0x70] sm:$0xff] %vm352_vm5, %v1106_v12  ;;  %v1158_v17 = vsel %vm352_vm5, %v1106_v12, 0.0  ;;  %v1182_v18 = vmul.f32 %v1106_v12, %v1106_v12 }
 0x267   : > { %v1159_v19 = vadd.f32 %v1158_v17, %v1157_v4  ;;  %v1213_v46 = vsel %vm352_vm5, %v1183_v13, 0.0 }
 0x268   : > { %v1211_v1 = vsel %vm352_vm5, %v1182_v18, 0.0 }
 0x269   : > { %v1161_v7 = vadd.f32 %v1160_v60, %v1159_v19  ;;  %v1212_v22 = vadd.f32 %v1211_v1, %v1210_v6 }
 0x26b   : > { %v1162_v24 = vrot.slane %v1161_v7, 4  ;;  %v1214_v25 = vadd.f32 %v1213_v46, %v1212_v22 }
 0x26d   : > { %v1163_v27 = vadd.f32 %v1162_v24, %v1161_v7  ;;  %v1215_v29 = vrot.slane %v1214_v25, 4 }
 0x26f   : > { %v1164_v30 = vrot.slane %v1163_v27, 2  ;;  %v1216_v37 = vadd.f32 %v1215_v29, %v1214_v25 }
 0x271   : > { %v1165_v26 = vadd.f32 %v1164_v30, %v1163_v27  ;;  %v1217_v61 = vrot.slane %v1216_v37, 2 }
 0x273   : > { %v1166_v8 = vrot.slane %v1165_v26, 1  ;;  %v1218_v36 = vadd.f32 %v1217_v61, %v1216_v37 }
 0x275   : > { %v1219_v51 = vrot.slane %v1218_v36, 1  ;;  %v1167_v47 = vadd.f32 %v1166_v8, %v1165_v26 }
 0x277   : > { %v1220_v10 = vadd.f32 %v1219_v51, %v1218_v36 }
 0x279   : > { %v1223_v23 = vsel %vm1222_vm13, %v1167_v47, %v1220_v10 }
 0x27a   : > { %v1224_v31 = vadd.f32 %v1223_v23, %v1221_v20 }
 0x27c   : > { %1226 = vst.msk [vmem:[%s2272_s3] sm:$0x3] %vm1225_vm14, %v1224_v31 }
 0x27d PF: > { %s14_s16 = sadd.s32 1, %s1579_s16   ;;  %s2273_s12 = smov %s1571_s14 }
 0x27e   : > { %p11_p10 = scmp.ge.s32.totalorder %s14_s16, 6   ;;  %s2274_s13 = smov %s1575_s15 }
 0x27f   : > { %s2275_s14 = smov %s2278_s17  ;;  %s2276_s15 = smov %s2282_s18 }
 0x280   :  { %13 = sbr.rel (!%p11_p10) target bundleno = 3 (0x3), region = 80 }

</bundles_post_ra>
